<compile_context>
chip_gen: v7x
topology: tpu7x:2x2x1
jax: 0.10.0
libtpu: 0.0.40
codegen_flags: <defaults>
</compile_context>

<pallas_src>
import math

import jax
import jax.numpy as jnp
from jax.experimental import pallas as pl
from jax.experimental.pallas import tpu as pltpu

LANE = 128  # pad trailing feature dims to full lanes


def _round_up(v, m):
    return -(-v // m) * m


def mlp_kernel(x_ref, w1_ref, b1_ref, w2_ref, b2_ref, w3_ref, b3_ref, o_ref):
    # fc1 + ReLU.  x arrives f32 straight from HBM; the bf16 cast is a cheap VPU
    # op and keeps the MXU on the single-pass bf16 path (f32 accumulation).
    x = x_ref[...].astype(w1_ref.dtype)
    h1 = jnp.dot(x, w1_ref[...], preferred_element_type=jnp.float32)
    h1 = jnp.maximum(h1 + b1_ref[...], 0.0)
    # fc2 + ReLU (output dim zero-padded to 128 lanes; padded columns stay 0).
    h2 = jnp.dot(h1.astype(w2_ref.dtype), w2_ref[...], preferred_element_type=jnp.float32)
    h2 = jnp.maximum(h2 + b2_ref[...], 0.0)
    # fc3 (padded to 128 lanes -> full-vreg, unmasked output stores).
    out = jnp.dot(h2.astype(w3_ref.dtype), w3_ref[...], preferred_element_type=jnp.float32)
    o_ref[...] = (out + b3_ref[...]).astype(o_ref.dtype)


def _pick_tm(batch, tm_max):
    if batch <= 256:
        # Single block; the "block == full array dim" exemption covers any batch
        # (including non-multiples of 8).
        return batch
    # >= 2 blocks so the "parallel" batch axis can shard across TensorCores;
    # multiples of 16 keep bf16 sublane groups full and stores unmasked; cap so
    # the f32 x tile (tm x in_dim x 4 B, double-buffered) stays well inside VMEM.
    half = -(-batch // 2)
    return min(tm_max, _round_up(half, 16))


def simple_model_forward(x, params, *, out_dim=6, tm_max=1024):
    """x: (B, input_size) float32.  params: bf16 (in, out)-layout weights with the
    fc2/fc3 output dims zero-padded to 128 lanes, f32 (1, out) biases (also padded).

    Returns f32 (B, out_dim).
    """
    w1, b1, w2, b2, w3, b3 = (
        params["w1"], params["b1"], params["w2"], params["b2"], params["w3"], params["b3"]
    )
    B = x.shape[0]
    in_dim, h1_dim = w1.shape
    h2_pad = w2.shape[1]
    out_pad = w3.shape[1]

    tm = _pick_tm(B, tm_max)
    grid = (pl.cdiv(B, tm),)  # partial last block instead of a host-side jnp.pad

    # Weights/biases: constant block index -> DMA'd once, VMEM-resident across the
    # whole batch grid; single-buffered (no point double-buffering a constant tile).
    def resident(arr):
        return pl.BlockSpec(arr.shape, lambda i: (0, 0), pipeline_mode=pl.Buffered(1))

    in_specs = [
        pl.BlockSpec((tm, in_dim), lambda i: (i, 0)),  # x: streamed / double-buffered
        resident(w1), resident(b1),
        resident(w2), resident(b2),
        resident(w3), resident(b3),
    ]
    out_specs = pl.BlockSpec((tm, out_pad), lambda i: (i, 0))

    flops = 2 * B * (in_dim * h1_dim + h1_dim * h2_pad + h2_pad * out_pad)
    bytes_accessed = (
        x.size * x.dtype.itemsize
        + sum(a.size * a.dtype.itemsize for a in (w1, b1, w2, b2, w3, b3))
        + B * out_pad * 4
    )

    out = pl.pallas_call(
        mlp_kernel,
        out_shape=jax.ShapeDtypeStruct((B, out_pad), jnp.float32),
        grid=grid,
        in_specs=in_specs,
        out_specs=out_specs,
        compiler_params=pltpu.CompilerParams(
            dimension_semantics=("parallel",),
            # Sized for tm <= 1024 with an ~4k-wide f32 x stream (~33 MiB peak):
            # explicit so v5e's 16 MiB scoped default doesn't shrink the tile,
            # and < v7x's 64 MiB physical VMEM.
            vmem_limit_bytes=48 * 1024 * 1024,
        ),
        cost_estimate=pl.CostEstimate(
            flops=flops, bytes_accessed=bytes_accessed, transcendentals=0
        ),
    )(x, w1, b1, w2, b2, w3, b3)

    # Drop the zero-padded output lanes.
    return out[:, :out_dim]


def init_params(key, input_size=3840, fc1_size=256, fc2_size=64, out_size=6):
    """Init matching SimpleModel.__init__ (kaiming_normal_ weights, PyTorch-default
    uniform biases).  Weights stored bf16 in (in, out) layout; hidden/output dims
    are zero-padded to multiples of 128 lanes for lane-dense kernel tiles."""
    ks = jax.random.split(key, 6)

    fc1_pad = _round_up(fc1_size, LANE)
    fc2_pad = _round_up(fc2_size, LANE)
    out_pad = _round_up(out_size, LANE)

    def kaiming(k, fan_in, fan_out, in_pad, out_pad_):
        std = math.sqrt(2.0 / fan_in)  # kaiming_normal_, mode='fan_in', relu gain
        w = (jax.random.normal(k, (fan_out, fan_in), jnp.float32) * std).T  # (in, out)
        w = jnp.pad(w, ((0, in_pad - fan_in), (0, out_pad_ - fan_out)))
        return w.astype(jnp.bfloat16)

    def bias(k, fan_in, fan_out, out_pad_):
        bound = 1.0 / math.sqrt(fan_in)  # PyTorch nn.Linear default bias init
        b = jax.random.uniform(k, (1, fan_out), jnp.float32, -bound, bound)
        return jnp.pad(b, ((0, 0), (0, out_pad_ - fan_out)))

    return {
        "w1": kaiming(ks[0], input_size, fc1_size, input_size, fc1_pad),
        "b1": bias(ks[1], input_size, fc1_size, fc1_pad),
        "w2": kaiming(ks[2], fc1_size, fc2_size, fc1_pad, fc2_pad),
        "b2": bias(ks[3], fc1_size, fc2_size, fc2_pad),
        "w3": kaiming(ks[4], fc2_size, out_size, fc2_pad, out_pad),
        "b3": bias(ks[5], fc2_size, out_size, out_pad),
    }


if __name__ == "__main__":
    key = jax.random.PRNGKey(0)
    k_x, k_p = jax.random.split(key)

    B, INPUT, FC1, FC2, OUT = 8, 3840, 256, 64, 6  # module defaults, small batch
    x = jax.random.normal(k_x, (B, INPUT), jnp.float32)
    params = init_params(k_p, input_size=INPUT, fc1_size=FC1, fc2_size=FC2, out_size=OUT)

    out = jax.jit(simple_model_forward)(x, params)
    jax.block_until_ready(out)

    # Reference: same math with the same dtype choices (bf16 weights/activations,
    # f32 accumulation) built from the padded params; padded lanes are exactly 0.
    def ref_fwd(xf):
        h = jnp.maximum(
            jnp.dot(xf.astype(jnp.bfloat16), params["w1"],
                    preferred_element_type=jnp.float32) + params["b1"], 0.0)
        h = jnp.maximum(
            jnp.dot(h.astype(jnp.bfloat16), params["w2"],
                    preferred_element_type=jnp.float32) + params["b2"], 0.0)
        h = jnp.dot(h.astype(jnp.bfloat16), params["w3"],
                    preferred_element_type=jnp.float32) + params["b3"]
        return h[:, :OUT]

    ref = ref_fwd(x)

    assert out.shape == (B, OUT)
    assert out.dtype == jnp.float32
    assert jnp.allclose(out, ref, atol=5e-2, rtol=5e-2), (
        f"max abs err {jnp.max(jnp.abs(out - ref))}"
    )

    print("KERNEL_OK")
</pallas_src>

<mosaic_0001>
module attributes {stable_mosaic.version = 11 : i64} {
  func.func @mlp_kernel(%arg0: i32, %arg1: memref<8x3840xf32, #tpu.memory_space<vmem>>, %arg2: memref<3840x256xbf16, #tpu.memory_space<vmem>>, %arg3: memref<1x256xf32, #tpu.memory_space<vmem>>, %arg4: memref<256x128xbf16, #tpu.memory_space<vmem>>, %arg5: memref<1x128xf32, #tpu.memory_space<vmem>>, %arg6: memref<128x128xbf16, #tpu.memory_space<vmem>>, %arg7: memref<1x128xf32, #tpu.memory_space<vmem>>, %arg8: memref<8x128xf32, #tpu.memory_space<vmem>>) attributes {dimension_semantics = [#tpu.dimension_semantics<parallel>], iteration_bounds = array<i64: 1>, scalar_prefetch = 0 : i64, scratch_operands = 0 : i64, tpu.core_type = #tpu.core_type<tc>, window_params = [{transform_indices = @transform_0, window_bounds = array<i64: 8, 3840>}, {pipeline_mode = #tpu.pipeline_mode<synchronous>, transform_indices = @transform_1, window_bounds = array<i64: 3840, 256>}, {pipeline_mode = #tpu.pipeline_mode<synchronous>, transform_indices = @transform_2, window_bounds = array<i64: 1, 256>}, {pipeline_mode = #tpu.pipeline_mode<synchronous>, transform_indices = @transform_3, window_bounds = array<i64: 256, 128>}, {pipeline_mode = #tpu.pipeline_mode<synchronous>, transform_indices = @transform_4, window_bounds = array<i64: 1, 128>}, {pipeline_mode = #tpu.pipeline_mode<synchronous>, transform_indices = @transform_5, window_bounds = array<i64: 128, 128>}, {pipeline_mode = #tpu.pipeline_mode<synchronous>, transform_indices = @transform_6, window_bounds = array<i64: 1, 128>}, {transform_indices = @transform_7, window_bounds = array<i64: 8, 128>}]} {
    %c0 = arith.constant 0 : index
    %c0_0 = arith.constant 0 : index
    %0 = vector.load %arg1[%c0, %c0_0] : memref<8x3840xf32, #tpu.memory_space<vmem>>, vector<8x3840xf32>
    %1 = arith.truncf %0 : vector<8x3840xf32> to vector<8x3840xbf16>
    %c0_1 = arith.constant 0 : index
    %c0_2 = arith.constant 0 : index
    %2 = vector.load %arg2[%c0_1, %c0_2] : memref<3840x256xbf16, #tpu.memory_space<vmem>>, vector<3840x256xbf16>
    %cst = arith.constant dense<0.000000e+00> : vector<8x256xf32>
    %3 = tpu.matmul %1, %2, %cst {dimension_numbers = #tpu.dot_dimension_numbers<[1], [0], [0], [1], [0, 0, 1, 1], [], []>} : vector<8x3840xbf16>, vector<3840x256xbf16>, vector<8x256xf32> -> vector<8x256xf32>
    %c0_3 = arith.constant 0 : index
    %c0_4 = arith.constant 0 : index
    %4 = vector.load %arg3[%c0_3, %c0_4] : memref<1x256xf32, #tpu.memory_space<vmem>>, vector<1x256xf32>
    %5 = vector.broadcast %4 : vector<1x256xf32> to vector<8x256xf32>
    %6 = arith.addf %3, %5 : vector<8x256xf32>
    %cst_5 = arith.constant 0.000000e+00 : f32
    %7 = vector.broadcast %cst_5 : f32 to vector<8x256xf32>
    %8 = arith.maximumf %6, %7 : vector<8x256xf32>
    %9 = arith.truncf %8 : vector<8x256xf32> to vector<8x256xbf16>
    %c0_6 = arith.constant 0 : index
    %c0_7 = arith.constant 0 : index
    %10 = vector.load %arg4[%c0_6, %c0_7] : memref<256x128xbf16, #tpu.memory_space<vmem>>, vector<256x128xbf16>
    %cst_8 = arith.constant dense<0.000000e+00> : vector<8x128xf32>
    %11 = tpu.matmul %9, %10, %cst_8 {dimension_numbers = #tpu.dot_dimension_numbers<[1], [0], [0], [1], [0, 0, 1, 1], [], []>} : vector<8x256xbf16>, vector<256x128xbf16>, vector<8x128xf32> -> vector<8x128xf32>
    %c0_9 = arith.constant 0 : index
    %c0_10 = arith.constant 0 : index
    %12 = vector.load %arg5[%c0_9, %c0_10] : memref<1x128xf32, #tpu.memory_space<vmem>>, vector<1x128xf32>
    %13 = vector.broadcast %12 : vector<1x128xf32> to vector<8x128xf32>
    %14 = arith.addf %11, %13 : vector<8x128xf32>
    %cst_11 = arith.constant 0.000000e+00 : f32
    %15 = vector.broadcast %cst_11 : f32 to vector<8x128xf32>
    %16 = arith.maximumf %14, %15 : vector<8x128xf32>
    %17 = arith.truncf %16 : vector<8x128xf32> to vector<8x128xbf16>
    %c0_12 = arith.constant 0 : index
    %c0_13 = arith.constant 0 : index
    %18 = vector.load %arg6[%c0_12, %c0_13] : memref<128x128xbf16, #tpu.memory_space<vmem>>, vector<128x128xbf16>
    %cst_14 = arith.constant dense<0.000000e+00> : vector<8x128xf32>
    %19 = tpu.matmul %17, %18, %cst_14 {dimension_numbers = #tpu.dot_dimension_numbers<[1], [0], [0], [1], [0, 0, 1, 1], [], []>} : vector<8x128xbf16>, vector<128x128xbf16>, vector<8x128xf32> -> vector<8x128xf32>
    %c0_15 = arith.constant 0 : index
    %c0_16 = arith.constant 0 : index
    %20 = vector.load %arg7[%c0_15, %c0_16] : memref<1x128xf32, #tpu.memory_space<vmem>>, vector<1x128xf32>
    %21 = vector.broadcast %20 : vector<1x128xf32> to vector<8x128xf32>
    %22 = arith.addf %19, %21 : vector<8x128xf32>
    %c0_17 = arith.constant 0 : index
    %c0_18 = arith.constant 0 : index
    %23 = vector.load %arg8[%c0_17, %c0_18] : memref<8x128xf32, #tpu.memory_space<vmem>>, vector<8x128xf32>
    tpu.vector_store %arg8[%c0_17, %c0_18], %22 {strides = array<i32>} : memref<8x128xf32, #tpu.memory_space<vmem>>, vector<8x128xf32>,
    return
  }
  func.func @transform_0(%arg0: i32) -> (i32, i32) {
    %c0_i32 = arith.constant 0 : i32
    %c0_i32_0 = arith.constant 0 : i32
    return %arg0, %c0_i32 : i32, i32
  }
  func.func @transform_1(%arg0: i32) -> (i32, i32) {
    %c0_i32 = arith.constant 0 : i32
    %c0_i32_0 = arith.constant 0 : i32
    %c0_i32_1 = arith.constant 0 : i32
    return %c0_i32, %c0_i32_0 : i32, i32
  }
  func.func @transform_2(%arg0: i32) -> (i32, i32) {
    %c0_i32 = arith.constant 0 : i32
    %c0_i32_0 = arith.constant 0 : i32
    %c0_i32_1 = arith.constant 0 : i32
    return %c0_i32, %c0_i32_0 : i32, i32
  }
  func.func @transform_3(%arg0: i32) -> (i32, i32) {
    %c0_i32 = arith.constant 0 : i32
    %c0_i32_0 = arith.constant 0 : i32
    %c0_i32_1 = arith.constant 0 : i32
    return %c0_i32, %c0_i32_0 : i32, i32
  }
  func.func @transform_4(%arg0: i32) -> (i32, i32) {
    %c0_i32 = arith.constant 0 : i32
    %c0_i32_0 = arith.constant 0 : i32
    %c0_i32_1 = arith.constant 0 : i32
    return %c0_i32, %c0_i32_0 : i32, i32
  }
  func.func @transform_5(%arg0: i32) -> (i32, i32) {
    %c0_i32 = arith.constant 0 : i32
    %c0_i32_0 = arith.constant 0 : i32
    %c0_i32_1 = arith.constant 0 : i32
    return %c0_i32, %c0_i32_0 : i32, i32
  }
  func.func @transform_6(%arg0: i32) -> (i32, i32) {
    %c0_i32 = arith.constant 0 : i32
    %c0_i32_0 = arith.constant 0 : i32
    %c0_i32_1 = arith.constant 0 : i32
    return %c0_i32, %c0_i32_0 : i32, i32
  }
  func.func @transform_7(%arg0: i32) -> (i32, i32) {
    %c0_i32 = arith.constant 0 : i32
    %c0_i32_0 = arith.constant 0 : i32
    return %arg0, %c0_i32 : i32, i32
  }
}

</mosaic_0001>

<bundles_post_ra>
// kernel: simple_model_forward.1
= control target key start
LH: loop header
LB: loop body
LE: loop exit
PB: predicated region body
PF: predicated region fallthrough
CT: control target
= control target key end

     0   :  { %12 = vsyncpa [#allocation3], 0  ;;  %s5700_s0 = inlined_call_operand.hbm [shape: f32[8,3840], index: 0, kind: input, shape index: {}]   ;;  %s5701_s1 = inlined_call_operand.hbm [shape: bf16[3840,256], index: 1, kind: input, shape index: {}]   ;;  %s5702_s2 = inlined_call_operand.hbm [shape: f32[1,256], index: 2, kind: input, shape index: {}]   ;;  %s5703_s3 = inlined_call_operand.hbm [shape: bf16[256,128], index: 3, kind: input, shape index: {}]   ;;  %s5704_s4 = inlined_call_operand.hbm [shape: f32[1,128], index: 4, kind: input, shape index: {}]   ;;  %s5705_s5 = inlined_call_operand.hbm [shape: bf16[128,128], index: 5, kind: input, shape index: {}]   ;;  %s5706_s6 = inlined_call_operand.hbm [shape: f32[1,128], index: 6, kind: input, shape index: {}]   ;;  %s5707_s7 = inlined_call_operand.hbm [shape: f32[8,128], index: 7, kind: output, shape index: {}]  }
   0x1   :  { %13 = vsyncpa [#allocation6], 0 }
   0x2   :  { %14 = vsyncpa [#allocation9], 0 }
   0x3   :  { %15 = vsyncpa [#allocation12], 0 }
   0x4   :  { %16 = vsyncpa [#allocation4], 0  ;;  %s5550_s24 = smov [#allocation5]   ;;  %s5364_s28 = scalar_lea.hbm %s5701_s1, 61440 }
   0x5   :  { %s32_s25 = sshll.u32 %s5550_s24, 4  ;;  %p5365_p0 = scmp.ne.s32.totalorder %s5701_s1, %s5364_s28  ;;  %s33_s25 = int_to_ptr.vmem [resolvable:$true] %s32_s25 }
   0x6   :  { %p5368_p1 = scmp.lt.u32.totalorder %s5364_s28, %s5701_s1 }
   0x8   :  { %p5370_p2 = pnand %p5368_p1, %p5365_p0 }
   0xa   :  { %5373 = shalt.err (!%p5370_p2)
}
   0xb   :  { %s5374_s10 = scalar_lea.vmem %s33_s25, 61440  ;;  %p5379_p4 = scmp.lt.s32.totalorder %s33_s25, %s33_s25 }
   0xc   :  { %p5375_p3 = scmp.ne.s32.totalorder %s33_s25, %s5374_s10  ;;  %p5380_p5 = scmp.lt.s32.totalorder %s5374_s10, %s5374_s10 }
   0xe   :  { %p5381_p6 = por %p5380_p5, %p5379_p4 }
  0x10   :  { %p5382_p7 = pnand %p5381_p6, %p5375_p3 }
  0x12   :  { %5385 = shalt.err (!%p5382_p7)
}
  0x13   :  { %s5551_s11 = smov 128   ;;  %s5552_s12 = smov 8  }
  0x14   :  { %38 = dma.hbm_to_vmem [thread:$0]  %s5701_s1, 61440, %s33_s25, [#allocation6], %s5551_s11, %s5551_s11, %s5552_s12  }
  0x15   :  { %s5553_s15 = smov [#allocation8]   ;;  %s5386_s19 = scalar_lea.hbm %s5703_s3, 2048 }
  0x16   :  { %s54_s16 = sshll.u32 %s5553_s15, 4  ;;  %p5387_p8 = scmp.ne.s32.totalorder %s5703_s3, %s5386_s19  ;;  %s55_s16 = int_to_ptr.vmem [resolvable:$true] %s54_s16 }
  0x17   :  { %p5390_p9 = scmp.lt.u32.totalorder %s5386_s19, %s5703_s3 }
  0x19   :  { %p5392_p10 = pnand %p5390_p9, %p5387_p8 }
  0x1b   :  { %5395 = shalt.err (!%p5392_p10)
}
  0x1c   :  { %s5396_s24 = scalar_lea.vmem %s55_s16, 2048  ;;  %p5401_p12 = scmp.lt.s32.totalorder %s55_s16, %s55_s16 }
  0x1d   :  { %p5397_p11 = scmp.ne.s32.totalorder %s55_s16, %s5396_s24  ;;  %p5402_p13 = scmp.lt.s32.totalorder %s5396_s24, %s5396_s24 }
  0x1f   :  { %p5403_p0 = por %p5402_p13, %p5401_p12 }
  0x21   :  { %p5404_p1 = pnand %p5403_p0, %p5397_p11 }
  0x23   :  { %5407 = shalt.err (!%p5404_p1)
}
  0x24   :  { %s5554_s1 = smov 64   ;;  %s5555_s25 = smov 4  }
  0x25   :  { %60 = dma.hbm_to_vmem [thread:$0]  %s5703_s3, 2048, %s55_s16, [#allocation9], %s5554_s1, %s5554_s1, %s5555_s25  }
  0x26   :  { %s5556_s28 = smov [#allocation11]   ;;  %s5557_s30 = smov [#allocation2]  }
  0x27   :  { %s76_s29 = sshll.u32 %s5556_s28, 4  ;;  %s23_s8 = sshll.u32 %s5557_s30, 4  ;;  %s77_s29 = int_to_ptr.vmem [resolvable:$true] %s76_s29  ;;  %s24_s8 = int_to_ptr.vmem [resolvable:$true] %s23_s8 }
  0x28   :  { %s5408_s11 = scalar_lea.hbm %s5705_s5, 1024 }
  0x29   :  { %p5409_p2 = scmp.ne.s32.totalorder %s5705_s5, %s5408_s11  ;;  %p5412_p3 = scmp.lt.u32.totalorder %s5408_s11, %s5705_s5 }
  0x2b   :  { %p5414_p4 = pnand %p5412_p3, %p5409_p2 }
  0x2d   :  { %5417 = shalt.err (!%p5414_p4)
}
  0x2e   :  { %s5418_s3 = scalar_lea.vmem %s77_s29, 1024  ;;  %p5423_p6 = scmp.lt.s32.totalorder %s77_s29, %s77_s29 }
  0x2f   :  { %p5419_p5 = scmp.ne.s32.totalorder %s77_s29, %s5418_s3  ;;  %p5424_p7 = scmp.lt.s32.totalorder %s5418_s3, %s5418_s3 }
  0x31   :  { %p5425_p8 = por %p5424_p7, %p5423_p6 }
  0x33   :  { %p5426_p9 = pnand %p5425_p8, %p5419_p5 }
  0x35   :  { %5429 = shalt.err (!%p5426_p9)
}
  0x36   :  { %82 = dma.hbm_to_vmem [thread:$0]  %s5705_s5, 1024, %s77_s29, [#allocation12], %s5554_s1, %s5554_s1, %s5555_s25  }
  0x37   :  { %s5430_s20 = scalar_lea.hbm %s5700_s0, 3840 }
  0x38   :  { %p5431_p10 = scmp.ne.s32.totalorder %s5700_s0, %s5430_s20  ;;  %p5434_p11 = scmp.lt.u32.totalorder %s5430_s20, %s5700_s0 }
  0x3a   :  { %p5436_p12 = pnand %p5434_p11, %p5431_p10 }
  0x3c   :  { %5439 = shalt.err (!%p5436_p12)
}
  0x3d   :  { %s5440_s26 = scalar_lea.vmem %s24_s8, 3840  ;;  %p5445_p0 = scmp.lt.s32.totalorder %s24_s8, %s24_s8 }
  0x3e   :  { %p5441_p13 = scmp.ne.s32.totalorder %s24_s8, %s5440_s26  ;;  %p5446_p1 = scmp.lt.s32.totalorder %s5440_s26, %s5440_s26 }
  0x40   :  { %p5447_p2 = por %p5446_p1, %p5445_p0 }
  0x42   :  { %p5448_p3 = pnand %p5447_p2, %p5441_p13 }
  0x44   :  { %5451 = shalt.err (!%p5448_p3)
}
  0x45   :  { %26 = dma.hbm_to_vmem [thread:$0]  %s5700_s0, 3840, %s24_s8, [#allocation3]  }
  0x46   :  { %s5558_s25 = smov [#allocation7]   ;;  %s5559_s28 = smov [#allocation10]  }
  0x47   :  { %s45_s27 = sshll.u32 %s5558_s25, 4  ;;  %s67_s29 = sshll.u32 %s5559_s28, 4  ;;  %s46_s27 = int_to_ptr.vmem [resolvable:$true] %s45_s27  ;;  %s68_s29 = int_to_ptr.vmem [resolvable:$true] %s67_s29 }
  0x48   :  { %s5452_s10 = scalar_lea.hbm %s5702_s2, 32 }
  0x49   :  { %p5453_p4 = scmp.ne.s32.totalorder %s5702_s2, %s5452_s10  ;;  %p5456_p5 = scmp.lt.u32.totalorder %s5452_s10, %s5702_s2 }
  0x4b   :  { %p5458_p6 = pnand %p5456_p5, %p5453_p4 }
  0x4d   :  { %5461 = shalt.err (!%p5458_p6)
}
  0x4e   :  { %s5462_s0 = scalar_lea.vmem %s46_s27, 32  ;;  %p5467_p8 = scmp.lt.s32.totalorder %s46_s27, %s46_s27 }
  0x4f   :  { %p5463_p7 = scmp.ne.s32.totalorder %s46_s27, %s5462_s0  ;;  %p5468_p9 = scmp.lt.s32.totalorder %s5462_s0, %s5462_s0 }
  0x51   :  { %p5469_p10 = por %p5468_p9, %p5467_p8 }
  0x53   :  { %p5470_p11 = pnand %p5469_p10, %p5463_p7 }
  0x55   :  { %5473 = shalt.err (!%p5470_p11)
}
  0x56   :  { %48 = dma.hbm_to_vmem [thread:$0]  %s5702_s2, 32, %s46_s27, [#allocation6]  }
  0x57   :  { %s5474_s17 = scalar_lea.hbm %s5704_s4, 16 }
  0x58   :  { %p5475_p12 = scmp.ne.s32.totalorder %s5704_s4, %s5474_s17  ;;  %p5478_p13 = scmp.lt.u32.totalorder %s5474_s17, %s5704_s4 }
  0x5a   :  { %p5480_p0 = pnand %p5478_p13, %p5475_p12 }
  0x5c   :  { %5483 = shalt.err (!%p5480_p0)
}
  0x5d   :  { %s5484_s22 = scalar_lea.vmem %s68_s29, 16  ;;  %s5488_s23 = scalar_lea.vmem %s68_s29, 32 }
  0x5e   :  { %p5485_p1 = scmp.ne.s32.totalorder %s68_s29, %s5484_s22  ;;  %p5489_p2 = scmp.lt.s32.totalorder %s68_s29, %s68_s29 }
  0x5f   :  { %p5490_p3 = scmp.lt.s32.totalorder %s5488_s23, %s5484_s22 }
  0x61   :  { %p5491_p4 = por %p5490_p3, %p5489_p2 }
  0x63   :  { %p5492_p5 = pnand %p5491_p4, %p5485_p1 }
  0x65   :  { %5495 = shalt.err (!%p5492_p5)
}
  0x66   :  { %70 = dma.hbm_to_vmem [thread:$0]  %s5704_s4, 16, %s68_s29, [#allocation9]  }
  0x67   :  { %s5560_s26 = smov [#allocation13]   ;;  %s5496_s27 = scalar_lea.hbm %s5706_s6, 16 }
  0x68   :  { %s89_s5 = sshll.u32 %s5560_s26, 4  ;;  %p5497_p6 = scmp.ne.s32.totalorder %s5706_s6, %s5496_s27  ;;  %s90_s5 = int_to_ptr.vmem [resolvable:$true] %s89_s5 }
  0x69   :  { %p5500_p7 = scmp.lt.u32.totalorder %s5496_s27, %s5706_s6 }
  0x6b   :  { %p5502_p8 = pnand %p5500_p7, %p5497_p6 }
  0x6d   :  { %5505 = shalt.err (!%p5502_p8)
}
  0x6e   :  { %s5506_s11 = scalar_lea.vmem %s90_s5, 16  ;;  %s5510_s4 = scalar_lea.vmem %s90_s5, 32 }
  0x6f   :  { %p5507_p9 = scmp.ne.s32.totalorder %s90_s5, %s5506_s11  ;;  %p5511_p10 = scmp.lt.s32.totalorder %s90_s5, %s90_s5 }
  0x70   :  { %p5512_p11 = scmp.lt.s32.totalorder %s5510_s4, %s5506_s11 }
  0x72   :  { %p5513_p12 = por %p5512_p11, %p5511_p10 }
  0x74   :  { %p5514_p13 = pnand %p5513_p12, %p5507_p9 }
  0x76   :  { %5517 = shalt.err (!%p5514_p13)
}
  0x77   :  { %92 = dma.hbm_to_vmem [thread:$0]  %s5706_s6, 16, %s90_s5, [#allocation12]  }
  0x78   :  { %5540 = dma.done.wait [#allocation3], 3840  }
  0x79   :  { %5541 = vsyncadd [#allocation3], 4294963456 }
  0x7a   :  { %5542 = dma.done.wait [#allocation6], 61472  }
  0x7b   :  { %5543 = vsyncadd [#allocation6], 4294905824 }
  0x7c   :  { %5544 = dma.done.wait [#allocation9], 2064  }
  0x7d   :  { %5545 = vsyncadd [#allocation9], 4294965232 }
  0x7e   :  { %5546 = dma.done.wait [#allocation12], 1040  }
  0x7f   :  { %5547 = vsyncadd [#allocation12], 4294966256  ;;  %v4620_v0 = vld [vmem:[#allocation5 + $0x4] ss:$8 sps:$4 sm:$0xff]   ;;  %v4624_v2 = vld [vmem:[#allocation5] ss:$8 sps:$4 sm:$0xff]  }
  0x80   :  { %v4622_v1 = vld [vmem:[#allocation5 + $0x704] ss:$8 sps:$4 sm:$0xff]   ;;  %3067 = vmatprep.subr.bf16.mxu1 %v4620_v0  ;;  %v4625_v3 = vld [vmem:[#allocation5 + $0x700] ss:$8 sps:$4 sm:$0xff]   ;;  %v4626_v4 = vld [vmem:[#allocation5 + $0x14] ss:$8 sps:$4 sm:$0xff]  }
  0x81   :  { %3354 = vmatprep.subr.bf16.mxu0 %v4622_v1  ;;  %3068 = vmatpush1.bf16.msra.mxu1 %v4624_v2  ;;  %v4628_v5 = vld [vmem:[#allocation5 + $0x714] ss:$8 sps:$4 sm:$0xff]   ;;  %v4630_v6 = vld [vmem:[#allocation5 + $0x10] ss:$8 sps:$4 sm:$0xff]   ;;  %v4632_v8 = vld [vmem:[#allocation5 + $0x24] ss:$8 sps:$4 sm:$0xff]  }
  0x82   :  { %3355 = vmatpush1.bf16.msra.mxu0 %v4625_v3  ;;  %3069 = vmatprep.subr.bf16.mxu1 %v4626_v4  ;;  %v4631_v7 = vld [vmem:[#allocation5 + $0x710] ss:$8 sps:$4 sm:$0xff]   ;;  %v4634_v9 = vld [vmem:[#allocation5 + $0x724] ss:$8 sps:$4 sm:$0xff]   ;;  %v4636_v10 = vld [vmem:[#allocation5 + $0x20] ss:$8 sps:$4 sm:$0xff]  }
  0x83   :  { %3356 = vmatprep.subr.bf16.mxu0 %v4628_v5  ;;  %v4637_v11 = vld [vmem:[#allocation5 + $0x720] ss:$8 sps:$4 sm:$0xff]   ;;  %v4638_v12 = vld [vmem:[#allocation5 + $0x34] ss:$8 sps:$4 sm:$0xff]   ;;  %v4642_v14 = vld [vmem:[#allocation5 + $0x30] ss:$8 sps:$4 sm:$0xff]  }
  0x84   :  { %v4640_v13 = vld [vmem:[#allocation5 + $0x734] ss:$8 sps:$4 sm:$0xff]   ;;  %v4643_v15 = vld [vmem:[#allocation5 + $0x730] ss:$8 sps:$4 sm:$0xff]   ;;  %v4644_v16 = vld [vmem:[#allocation5 + $0x44] ss:$8 sps:$4 sm:$0xff]  }
  0x85   :  { %3070 = vmatpush1.bf16.msra.mxu1 %v4630_v6  ;;  %v4646_v17 = vld [vmem:[#allocation5 + $0x744] ss:$8 sps:$4 sm:$0xff]   ;;  %v4648_v18 = vld [vmem:[#allocation5 + $0x40] ss:$8 sps:$4 sm:$0xff]   ;;  %v4650_v20 = vld [vmem:[#allocation5 + $0x54] ss:$8 sps:$4 sm:$0xff]  }
  0x86   :  { %3357 = vmatpush1.bf16.msra.mxu0 %v4631_v7  ;;  %3071 = vmatprep.subr.bf16.mxu1 %v4632_v8  ;;  %v4649_v19 = vld [vmem:[#allocation5 + $0x740] ss:$8 sps:$4 sm:$0xff]   ;;  %v4652_v21 = vld [vmem:[#allocation5 + $0x754] ss:$8 sps:$4 sm:$0xff]   ;;  %v4654_v22 = vld [vmem:[#allocation5 + $0x50] ss:$8 sps:$4 sm:$0xff]  }
  0x87   :  { %3358 = vmatprep.subr.bf16.mxu0 %v4634_v9  ;;  %v4655_v23 = vld [vmem:[#allocation5 + $0x750] ss:$8 sps:$4 sm:$0xff]   ;;  %v4656_v24 = vld [vmem:[#allocation5 + $0x64] ss:$8 sps:$4 sm:$0xff]   ;;  %v4660_v26 = vld [vmem:[#allocation5 + $0x60] ss:$8 sps:$4 sm:$0xff]  }
  0x88   :  { %v4658_v25 = vld [vmem:[#allocation5 + $0x764] ss:$8 sps:$4 sm:$0xff]   ;;  %v4661_v27 = vld [vmem:[#allocation5 + $0x760] ss:$8 sps:$4 sm:$0xff]   ;;  %v4662_v28 = vld [vmem:[#allocation5 + $0x74] ss:$8 sps:$4 sm:$0xff]  }
  0x89   :  { %3072 = vmatpush1.bf16.msra.mxu1 %v4636_v10  ;;  %v4664_v29 = vld [vmem:[#allocation5 + $0x774] ss:$8 sps:$4 sm:$0xff]   ;;  %v4666_v30 = vld [vmem:[#allocation5 + $0x70] ss:$8 sps:$4 sm:$0xff]   ;;  %v4668_v32 = vld [vmem:[#allocation5 + $0x84] ss:$8 sps:$4 sm:$0xff]  }
  0x8a   :  { %3359 = vmatpush1.bf16.msra.mxu0 %v4637_v11  ;;  %3073 = vmatprep.subr.bf16.mxu1 %v4638_v12  ;;  %v4667_v31 = vld [vmem:[#allocation5 + $0x770] ss:$8 sps:$4 sm:$0xff]   ;;  %v4670_v33 = vld [vmem:[#allocation5 + $0x784] ss:$8 sps:$4 sm:$0xff]   ;;  %v4672_v34 = vld [vmem:[#allocation5 + $0x80] ss:$8 sps:$4 sm:$0xff]  }
  0x8b   :  { %3360 = vmatprep.subr.bf16.mxu0 %v4640_v13  ;;  %v4673_v35 = vld [vmem:[#allocation5 + $0x780] ss:$8 sps:$4 sm:$0xff]   ;;  %v4674_v36 = vld [vmem:[#allocation5 + $0x94] ss:$8 sps:$4 sm:$0xff]   ;;  %v4678_v38 = vld [vmem:[#allocation5 + $0x90] ss:$8 sps:$4 sm:$0xff]  }
  0x8c   :  { %v4676_v37 = vld [vmem:[#allocation5 + $0x794] ss:$8 sps:$4 sm:$0xff]   ;;  %v4679_v39 = vld [vmem:[#allocation5 + $0x790] ss:$8 sps:$4 sm:$0xff]   ;;  %v4680_v40 = vld [vmem:[#allocation5 + $0xa4] ss:$8 sps:$4 sm:$0xff]  }
  0x8d   :  { %3074 = vmatpush1.bf16.msra.mxu1 %v4642_v14  ;;  %v4682_v41 = vld [vmem:[#allocation5 + $0x7a4] ss:$8 sps:$4 sm:$0xff]   ;;  %v4684_v42 = vld [vmem:[#allocation5 + $0xa0] ss:$8 sps:$4 sm:$0xff]   ;;  %v4686_v44 = vld [vmem:[#allocation5 + $0xb4] ss:$8 sps:$4 sm:$0xff]  }
  0x8e   :  { %3361 = vmatpush1.bf16.msra.mxu0 %v4643_v15  ;;  %3075 = vmatprep.subr.bf16.mxu1 %v4644_v16  ;;  %v4685_v43 = vld [vmem:[#allocation5 + $0x7a0] ss:$8 sps:$4 sm:$0xff]   ;;  %v4688_v45 = vld [vmem:[#allocation5 + $0x7b4] ss:$8 sps:$4 sm:$0xff]   ;;  %v4690_v47 = vld [vmem:[#allocation5 + $0xb0] ss:$8 sps:$4 sm:$0xff]  }
  0x8f   :  { %3362 = vmatprep.subr.bf16.mxu0 %v4646_v17  ;;  %v116_v46 = vld [vmem:[#allocation2 + $0x8] sm:$0xff]  ;;  %v130_v50 = vld [vmem:[#allocation2 + $0x78] sm:$0xff]  ;;  %v115_v5 = vld [vmem:[#allocation2] sm:$0xff]  ;;  %vm5562_vm0 = vmmov 0   ;;  %s5563_s6 = smov [#allocation14]  }
  0x90   :  { %v146_v48 = vpack.c.bf16 %v116_v46, %v116_v46  ;;  %v4691_v49 = vld [vmem:[#allocation5 + $0x7b0] ss:$8 sps:$4 sm:$0xff]   ;;  %v4692_v51 = vld [vmem:[#allocation5 + $0xc4] ss:$8 sps:$4 sm:$0xff]   ;;  %v160_v53 = vpack.c.bf16 %v130_v50, %v130_v50  ;;  %v4696_v54 = vld [vmem:[#allocation5 + $0xc0] ss:$8 sps:$4 sm:$0xff]   ;;  %v145_v10 = vpack.c.bf16 %v115_v5, %v115_v5 }
  0x91   :  { %3076 = vmatpush1.bf16.msra.mxu1 %v4648_v18  ;;  %v4694_v52 = vld [vmem:[#allocation5 + $0x7c4] ss:$8 sps:$4 sm:$0xff]   ;;  %v4697_v55 = vld [vmem:[#allocation5 + $0x7c0] ss:$8 sps:$4 sm:$0xff]   ;;  %v4698_v56 = vld [vmem:[#allocation5 + $0xd4] ss:$8 sps:$4 sm:$0xff]  }
  0x92   :  { %3363 = vmatpush1.bf16.msra.mxu0 %v4649_v19  ;;  %3077 = vmatprep.subr.bf16.mxu1 %v4650_v20  ;;  %v4700_v57 = vld [vmem:[#allocation5 + $0x7d4] ss:$8 sps:$4 sm:$0xff]   ;;  %v4702_v58 = vld [vmem:[#allocation5 + $0xd0] ss:$8 sps:$4 sm:$0xff]   ;;  %v4704_v60 = vld [vmem:[#allocation5 + $0xe4] ss:$8 sps:$4 sm:$0xff]  }
  0x93   :  { %3364 = vmatprep.subr.bf16.mxu0 %v4652_v21  ;;  %3099 = vmatprep.mubr.bf16.mxu1 %v146_v48  ;;  %v4703_v59 = vld [vmem:[#allocation5 + $0x7d0] ss:$8 sps:$4 sm:$0xff]   ;;  %v4706_v61 = vld [vmem:[#allocation5 + $0x7e4] ss:$8 sps:$4 sm:$0xff]   ;;  %v4708_v62 = vld [vmem:[#allocation5 + $0xe0] ss:$8 sps:$4 sm:$0xff]  }
  0x94   :  { %3386 = vmatprep.mubr.bf16.mxu0 %v160_v53  ;;  %v4709_v63 = vld [vmem:[#allocation5 + $0x7e0] ss:$8 sps:$4 sm:$0xff]   ;;  %v4710_v0 = vld [vmem:[#allocation5 + $0xf4] ss:$8 sps:$4 sm:$0xff]   ;;  %v4714_v2 = vld [vmem:[#allocation5 + $0xf0] ss:$8 sps:$4 sm:$0xff]  }
  0x95   :  { %3078 = vmatpush1.bf16.msra.mxu1 %v4654_v22  ;;  %v4712_v1 = vld [vmem:[#allocation5 + $0x7f4] ss:$8 sps:$4 sm:$0xff]   ;;  %v4715_v3 = vld [vmem:[#allocation5 + $0x7f0] ss:$8 sps:$4 sm:$0xff]   ;;  %v4718_v4 = vld [vmem:[#allocation5 + $0x104] ss:$8 sps:$4 sm:$0xff]  }
  0x96   :  { %3365 = vmatpush1.bf16.msra.mxu0 %v4655_v23  ;;  %3079 = vmatprep.subr.bf16.mxu1 %v4656_v24  ;;  %v129_v6 = vld [vmem:[#allocation2 + $0x70] sm:$0xff]  ;;  %v4724_v12 = vld [vmem:[#allocation5 + $0x114] ss:$8 sps:$4 sm:$0xff]   ;;  %v4722_v14 = vld [vmem:[#allocation5 + $0x110] ss:$8 sps:$4 sm:$0xff]   ;;  %s3981_s13 = sshll.u32 %s5563_s6, 4  ;;  %s3982_s13 = int_to_ptr.vmem [resolvable:$true] %s3981_s13 }
  0x97   :  { %3366 = vmatprep.subr.bf16.mxu0 %v4658_v25  ;;  %v4721_v7 = vld [vmem:[#allocation5 + $0x804] ss:$8 sps:$4 sm:$0xff]   ;;  %v4716_v8 = vld [vmem:[#allocation5 + $0x100] ss:$8 sps:$4 sm:$0xff]   ;;  %v159_v11 = vpack.c.bf16 %v129_v6, %v129_v6  ;;  %v4727_v13 = vld [vmem:[#allocation5 + $0x814] ss:$8 sps:$4 sm:$0xff]   ;;  %p5523_p1 = scmp.lt.s32.totalorder %s3982_s13, %s3982_s13 }
  0x98   :  { %v4719_v9 = vld [vmem:[#allocation5 + $0x800] ss:$8 sps:$4 sm:$0xff]   ;;  %v4725_v15 = vld [vmem:[#allocation5 + $0x810] ss:$8 sps:$4 sm:$0xff]   ;;  %v4730_v16 = vld [vmem:[#allocation5 + $0x124] ss:$8 sps:$4 sm:$0xff]  }
  0x99   :  { %3080 = vmatpush1.bf16.msra.mxu1 %v4660_v26  ;;  %v4733_v17 = vld [vmem:[#allocation5 + $0x824] ss:$8 sps:$4 sm:$0xff]   ;;  %v4728_v18 = vld [vmem:[#allocation5 + $0x120] ss:$8 sps:$4 sm:$0xff]   ;;  %v4736_v20 = vld [vmem:[#allocation5 + $0x134] ss:$8 sps:$4 sm:$0xff]  }
  0x9a   :  { %3367 = vmatpush1.bf16.msra.mxu0 %v4661_v27  ;;  %3081 = vmatprep.subr.bf16.mxu1 %v4662_v28  ;;  %v4731_v19 = vld [vmem:[#allocation5 + $0x820] ss:$8 sps:$4 sm:$0xff]   ;;  %v4739_v21 = vld [vmem:[#allocation5 + $0x834] ss:$8 sps:$4 sm:$0xff]   ;;  %v4734_v22 = vld [vmem:[#allocation5 + $0x130] ss:$8 sps:$4 sm:$0xff]  }
  0x9b   :  { %3368 = vmatprep.subr.bf16.mxu0 %v4664_v29  ;;  %v4737_v23 = vld [vmem:[#allocation5 + $0x830] ss:$8 sps:$4 sm:$0xff]   ;;  %v4742_v24 = vld [vmem:[#allocation5 + $0x144] ss:$8 sps:$4 sm:$0xff]   ;;  %v4740_v26 = vld [vmem:[#allocation5 + $0x140] ss:$8 sps:$4 sm:$0xff]  }
  0x9c   :  { %v4745_v25 = vld [vmem:[#allocation5 + $0x844] ss:$8 sps:$4 sm:$0xff]   ;;  %v4743_v27 = vld [vmem:[#allocation5 + $0x840] ss:$8 sps:$4 sm:$0xff]   ;;  %v4748_v28 = vld [vmem:[#allocation5 + $0x154] ss:$8 sps:$4 sm:$0xff]  }
  0x9d   :  { %3082 = vmatpush1.bf16.msra.mxu1 %v4666_v30  ;;  %v4751_v29 = vld [vmem:[#allocation5 + $0x854] ss:$8 sps:$4 sm:$0xff]   ;;  %v4746_v30 = vld [vmem:[#allocation5 + $0x150] ss:$8 sps:$4 sm:$0xff]   ;;  %v4764_v46 = vld [vmem:[#allocation5 + $0x180] ss:$8 sps:$4 sm:$0xff]  }
  0x9e   :  { %3369 = vmatpush1.bf16.msra.mxu0 %v4667_v31  ;;  %3083 = vmatprep.subr.bf16.mxu1 %v4668_v32  ;;  %v4749_v31 = vld [vmem:[#allocation5 + $0x850] ss:$8 sps:$4 sm:$0xff]   ;;  %v4754_v32 = vld [vmem:[#allocation5 + $0x164] ss:$8 sps:$4 sm:$0xff]   ;;  %v4772_v48 = vld [vmem:[#allocation5 + $0x194] ss:$8 sps:$4 sm:$0xff]  }
  0x9f   :  { %3370 = vmatprep.subr.bf16.mxu0 %v4670_v33  ;;  %v4757_v33 = vld [vmem:[#allocation5 + $0x864] ss:$8 sps:$4 sm:$0xff]   ;;  %v4770_v50 = vld [vmem:[#allocation5 + $0x190] ss:$8 sps:$4 sm:$0xff]   ;;  %v4800_v6 = vld [vmem:[#allocation5 + $0x1e0] ss:$8 sps:$4 sm:$0xff]  }
  0xa0   :  { %v4781_v53 = vld [vmem:[#allocation5 + $0x8a4] ss:$8 sps:$4 sm:$0xff]   ;;  %s5518_s14 = scalar_lea.vmem %s3982_s13, 128 }
  0xa1   :  { %3084 = vmatpush1.bf16.msra.mxu1 %v4672_v34  ;;  %v118_v34 = vld [vmem:[#allocation2 + $0x18] sm:$0xff]  ;;  %p5519_p0 = scmp.ne.s32.totalorder %s3982_s13, %s5518_s14  ;;  %p5524_p2 = scmp.lt.s32.totalorder %s5518_s14, %s5518_s14 }
  0xa2   :  { %3371 = vmatpush1.bf16.msra.mxu0 %v4673_v35  ;;  %3085 = vmatprep.subr.bf16.mxu1 %v4674_v36  ;;  %v4752_v35 = vld [vmem:[#allocation5 + $0x160] ss:$8 sps:$4 sm:$0xff]   ;;  %v148_v36 = vpack.c.bf16 %v118_v34, %v118_v34  ;;  %v4805_v5 = vld [vmem:[#allocation5 + $0x8e4] ss:$8 sps:$4 sm:$0xff]   ;;  %v4830_v34 = vld [vmem:[#allocation5 + $0x230] ss:$8 sps:$4 sm:$0xff]  }
  0xa3   :  { %3372 = vmatprep.subr.bf16.mxu0 %v4676_v37  ;;  %v4755_v37 = vld [vmem:[#allocation5 + $0x860] ss:$8 sps:$4 sm:$0xff]   ;;  %p5525_p3 = por %p5524_p2, %p5523_p1 }
  0xa5   :  { %3086 = vmatpush1.bf16.msra.mxu1 %v4678_v38  ;;  %v132_v38 = vld [vmem:[#allocation2 + $0x88] sm:$0xff]  ;;  %p5526_p4 = pnand %p5525_p3, %p5519_p0 }
  0xa6   :  { %3373 = vmatpush1.bf16.msra.mxu0 %v4679_v39  ;;  %3087 = vmatprep.subr.bf16.mxu1 %v4680_v40  ;;  %v4760_v39 = vld [vmem:[#allocation5 + $0x174] ss:$8 sps:$4 sm:$0xff]  }
  0xa7   :  { %3374 = vmatprep.subr.bf16.mxu0 %v4682_v41  ;;  %v4763_v40 = vld [vmem:[#allocation5 + $0x874] ss:$8 sps:$4 sm:$0xff]   ;;  %v162_v41 = vpack.c.bf16 %v132_v38, %v132_v38  ;;  %v4836_v38 = vld [vmem:[#allocation5 + $0x240] ss:$8 sps:$4 sm:$0xff]  }
  0xa9   :  { %3088 = vmatpush1.bf16.msra.mxu1 %v4684_v42  ;;  %v4758_v42 = vld [vmem:[#allocation5 + $0x170] ss:$8 sps:$4 sm:$0xff]  }
  0xaa   :  { %3375 = vmatpush1.bf16.msra.mxu0 %v4685_v43  ;;  %3089 = vmatprep.subr.bf16.mxu1 %v4686_v44  ;;  %v4761_v43 = vld [vmem:[#allocation5 + $0x870] ss:$8 sps:$4 sm:$0xff]   ;;  %v4766_v44 = vld [vmem:[#allocation5 + $0x184] ss:$8 sps:$4 sm:$0xff]  }
  0xab   :  { %3376 = vmatprep.subr.bf16.mxu0 %v4688_v45  ;;  %v4769_v45 = vld [vmem:[#allocation5 + $0x884] ss:$8 sps:$4 sm:$0xff]  }
  0xad   :  { %3090 = vmatpush1.bf16.msra.mxu1 %v4690_v47  ;;  %v4767_v47 = vld [vmem:[#allocation5 + $0x880] ss:$8 sps:$4 sm:$0xff]  }
  0xae   :  { %3377 = vmatpush1.bf16.msra.mxu0 %v4691_v49  ;;  %3091 = vmatprep.subr.bf16.mxu1 %v4692_v51  ;;  %v4775_v49 = vld [vmem:[#allocation5 + $0x894] ss:$8 sps:$4 sm:$0xff]   ;;  %v4773_v51 = vld [vmem:[#allocation5 + $0x890] ss:$8 sps:$4 sm:$0xff]  }
  0xaf   :  { %3378 = vmatprep.subr.bf16.mxu0 %v4694_v52  ;;  %v4778_v52 = vld [vmem:[#allocation5 + $0x1a4] ss:$8 sps:$4 sm:$0xff]  }
  0xb1   :  { %3092 = vmatpush1.bf16.msra.mxu1 %v4696_v54  ;;  %v4776_v54 = vld [vmem:[#allocation5 + $0x1a0] ss:$8 sps:$4 sm:$0xff]  }
  0xb2   :  { %3379 = vmatpush1.bf16.msra.mxu0 %v4697_v55  ;;  %3093 = vmatprep.subr.bf16.mxu1 %v4698_v56  ;;  %v4779_v55 = vld [vmem:[#allocation5 + $0x8a0] ss:$8 sps:$4 sm:$0xff]   ;;  %v4784_v56 = vld [vmem:[#allocation5 + $0x1b4] ss:$8 sps:$4 sm:$0xff]  }
  0xb3   :  { %3380 = vmatprep.subr.bf16.mxu0 %v4700_v57  ;;  %v4787_v57 = vld [vmem:[#allocation5 + $0x8b4] ss:$8 sps:$4 sm:$0xff]  }
  0xb5   :  { %3094 = vmatpush1.bf16.msra.mxu1 %v4702_v58  ;;  %v4782_v58 = vld [vmem:[#allocation5 + $0x1b0] ss:$8 sps:$4 sm:$0xff]  }
  0xb6   :  { %3381 = vmatpush1.bf16.msra.mxu0 %v4703_v59  ;;  %3095 = vmatprep.subr.bf16.mxu1 %v4704_v60  ;;  %v4785_v59 = vld [vmem:[#allocation5 + $0x8b0] ss:$8 sps:$4 sm:$0xff]   ;;  %v4790_v60 = vld [vmem:[#allocation5 + $0x1c4] ss:$8 sps:$4 sm:$0xff]  }
  0xb7   :  { %3382 = vmatprep.subr.bf16.mxu0 %v4706_v61  ;;  %v4793_v61 = vld [vmem:[#allocation5 + $0x8c4] ss:$8 sps:$4 sm:$0xff]  }
  0xb9   :  { %3096 = vmatpush1.bf16.msra.mxu1 %v4708_v62  ;;  %v4788_v62 = vld [vmem:[#allocation5 + $0x1c0] ss:$8 sps:$4 sm:$0xff]  }
  0xba   :  { %3383 = vmatpush1.bf16.msra.mxu0 %v4709_v63  ;;  %3097 = vmatprep.subr.bf16.mxu1 %v4710_v0  ;;  %v4791_v63 = vld [vmem:[#allocation5 + $0x8c0] ss:$8 sps:$4 sm:$0xff]   ;;  %v4796_v0 = vld [vmem:[#allocation5 + $0x1d4] ss:$8 sps:$4 sm:$0xff]  }
  0xbb   :  { %3384 = vmatprep.subr.bf16.mxu0 %v4712_v1  ;;  %v4799_v1 = vld [vmem:[#allocation5 + $0x8d4] ss:$8 sps:$4 sm:$0xff]  }
  0xbd   :  { %3098 = vmatpush1.bf16.msra.mxu1 %v4714_v2  ;;  %v4794_v2 = vld [vmem:[#allocation5 + $0x1d0] ss:$8 sps:$4 sm:$0xff]  }
  0xbe   :  { %3385 = vmatpush1.bf16.msra.mxu0 %v4715_v3  ;;  %3108 = vmatprep.subr.bf16.mxu1 %v4718_v4  ;;  %v4797_v3 = vld [vmem:[#allocation5 + $0x8d0] ss:$8 sps:$4 sm:$0xff]   ;;  %v4802_v4 = vld [vmem:[#allocation5 + $0x1e4] ss:$8 sps:$4 sm:$0xff]  }
  0xbf   :  { %3395 = vmatprep.subr.bf16.mxu0 %v4721_v7  ;;  %v4803_v7 = vld [vmem:[#allocation5 + $0x8e0] ss:$8 sps:$4 sm:$0xff]  }
  0xc0   :  { %3100 = vmatmul.mubr.bf16.vlgmr.msra.gmra.mrb[0].mxu1 %v145_v10  ;;  %v4806_v10 = vld [vmem:[#allocation5 + $0x1f0] ss:$8 sps:$4 sm:$0xff]  }
  0xc1   :  { %3387 = vmatmul.mubr.bf16.vlgmr.msra.gmra.mrb[0].mxu0 %v159_v11  ;;  %3109 = vmatpush1.bf16.msra.mxu1 %v4716_v8  ;;  %v4808_v8 = vld [vmem:[#allocation5 + $0x1f4] ss:$8 sps:$4 sm:$0xff]   ;;  %v4809_v11 = vld [vmem:[#allocation5 + $0x8f0] ss:$8 sps:$4 sm:$0xff]  }
  0xc2   :  { %3396 = vmatpush1.bf16.msra.mxu0 %v4719_v9  ;;  %3110 = vmatprep.subr.bf16.mxu1 %v4724_v12  ;;  %v4811_v9 = vld [vmem:[#allocation5 + $0x8f4] ss:$8 sps:$4 sm:$0xff]   ;;  %v4814_v12 = vld [vmem:[#allocation5 + $0x204] ss:$8 sps:$4 sm:$0xff]  }
  0xc3   :  { %3397 = vmatprep.subr.bf16.mxu0 %v4727_v13  ;;  %3140 = vmatprep.mubr.bf16.mxu1 %v148_v36  ;;  %v117_v13 = vld [vmem:[#allocation2 + $0x10] sm:$0xff] }
  0xc4   :  { %3427 = vmatprep.mubr.bf16.mxu0 %v162_v41  ;;  %v4838_v36 = vld [vmem:[#allocation5 + $0x244] ss:$8 sps:$4 sm:$0xff]   ;;  %v4847_v41 = vld [vmem:[#allocation5 + $0x954] ss:$8 sps:$4 sm:$0xff]  }
  0xc5   :  { %3111 = vmatpush1.bf16.msra.mxu1 %v4722_v14  ;;  %v131_v14 = vld [vmem:[#allocation2 + $0x80] sm:$0xff] }
  0xc6   :  { %3398 = vmatpush1.bf16.msra.mxu0 %v4725_v15  ;;  %3112 = vmatprep.subr.bf16.mxu1 %v4730_v16  ;;  %v4817_v15 = vld [vmem:[#allocation5 + $0x904] ss:$8 sps:$4 sm:$0xff]   ;;  %v4812_v16 = vld [vmem:[#allocation5 + $0x200] ss:$8 sps:$4 sm:$0xff]  }
  0xc7   :  { %3399 = vmatprep.subr.bf16.mxu0 %v4733_v17  ;;  %v4815_v17 = vld [vmem:[#allocation5 + $0x900] ss:$8 sps:$4 sm:$0xff]  }
  0xc9   :  { %3113 = vmatpush1.bf16.msra.mxu1 %v4728_v18  ;;  %v147_v18 = vpack.c.bf16 %v117_v13, %v117_v13  ;;  %v4901_v13 = vld [vmem:[#allocation5 + $0x9e4] ss:$8 sps:$4 sm:$0xff]  }
  0xca   :  { %3400 = vmatpush1.bf16.msra.mxu0 %v4731_v19  ;;  %3114 = vmatprep.subr.bf16.mxu1 %v4736_v20  ;;  %v161_v19 = vpack.c.bf16 %v131_v14, %v131_v14  ;;  %v4820_v20 = vld [vmem:[#allocation5 + $0x214] ss:$8 sps:$4 sm:$0xff]   ;;  %v4896_v14 = vld [vmem:[#allocation5 + $0x2e0] ss:$8 sps:$4 sm:$0xff]  }
  0xcb   :  { %3401 = vmatprep.subr.bf16.mxu0 %v4739_v21  ;;  %v4823_v21 = vld [vmem:[#allocation5 + $0x914] ss:$8 sps:$4 sm:$0xff]  }
  0xcd   :  { %3115 = vmatpush1.bf16.msra.mxu1 %v4734_v22  ;;  %v120_v22 = vld [vmem:[#allocation2 + $0x28] sm:$0xff] }
  0xce   :  { %3402 = vmatpush1.bf16.msra.mxu0 %v4737_v23  ;;  %3116 = vmatprep.subr.bf16.mxu1 %v4742_v24  ;;  %v4818_v23 = vld [vmem:[#allocation5 + $0x210] ss:$8 sps:$4 sm:$0xff]   ;;  %v150_v24 = vpack.c.bf16 %v120_v22, %v120_v22  ;;  %v133_v22 = vld [vmem:[#allocation2 + $0x90] sm:$0xff] }
  0xcf   :  { %3403 = vmatprep.subr.bf16.mxu0 %v4745_v25  ;;  %v4821_v25 = vld [vmem:[#allocation5 + $0x910] ss:$8 sps:$4 sm:$0xff]  }
  0xd1   :  { %3117 = vmatpush1.bf16.msra.mxu1 %v4740_v26  ;;  %v134_v26 = vld [vmem:[#allocation2 + $0x98] sm:$0xff] }
  0xd2   :  { %3404 = vmatpush1.bf16.msra.mxu0 %v4743_v27  ;;  %3118 = vmatprep.subr.bf16.mxu1 %v4748_v28  ;;  %v4826_v27 = vld [vmem:[#allocation5 + $0x224] ss:$8 sps:$4 sm:$0xff]  }
  0xd3   :  { %3405 = vmatprep.subr.bf16.mxu0 %v4751_v29  ;;  %v4829_v28 = vld [vmem:[#allocation5 + $0x924] ss:$8 sps:$4 sm:$0xff]   ;;  %v164_v29 = vpack.c.bf16 %v134_v26, %v134_v26 }
  0xd5   :  { %3119 = vmatpush1.bf16.msra.mxu1 %v4746_v30  ;;  %v4824_v30 = vld [vmem:[#allocation5 + $0x220] ss:$8 sps:$4 sm:$0xff]  }
  0xd6   :  { %3406 = vmatpush1.bf16.msra.mxu0 %v4749_v31  ;;  %3120 = vmatprep.subr.bf16.mxu1 %v4754_v32  ;;  %v4827_v31 = vld [vmem:[#allocation5 + $0x920] ss:$8 sps:$4 sm:$0xff]   ;;  %v4832_v32 = vld [vmem:[#allocation5 + $0x234] ss:$8 sps:$4 sm:$0xff]  }
  0xd7   :  { %3407 = vmatprep.subr.bf16.mxu0 %v4757_v33  ;;  %v4835_v33 = vld [vmem:[#allocation5 + $0x934] ss:$8 sps:$4 sm:$0xff]  }
  0xd9   :  { %3121 = vmatpush1.bf16.msra.mxu1 %v4752_v35  ;;  %v4833_v35 = vld [vmem:[#allocation5 + $0x930] ss:$8 sps:$4 sm:$0xff]  }
  0xda   :  { %3408 = vmatpush1.bf16.msra.mxu0 %v4755_v37  ;;  %3122 = vmatprep.subr.bf16.mxu1 %v4760_v39  ;;  %v4841_v37 = vld [vmem:[#allocation5 + $0x944] ss:$8 sps:$4 sm:$0xff]   ;;  %v4839_v39 = vld [vmem:[#allocation5 + $0x940] ss:$8 sps:$4 sm:$0xff]  }
  0xdb   :  { %3409 = vmatprep.subr.bf16.mxu0 %v4763_v40  ;;  %v4844_v40 = vld [vmem:[#allocation5 + $0x254] ss:$8 sps:$4 sm:$0xff]  }
  0xdd   :  { %3123 = vmatpush1.bf16.msra.mxu1 %v4758_v42  ;;  %v4842_v42 = vld [vmem:[#allocation5 + $0x250] ss:$8 sps:$4 sm:$0xff]  }
  0xde   :  { %3410 = vmatpush1.bf16.msra.mxu0 %v4761_v43  ;;  %3124 = vmatprep.subr.bf16.mxu1 %v4766_v44  ;;  %v4845_v43 = vld [vmem:[#allocation5 + $0x950] ss:$8 sps:$4 sm:$0xff]   ;;  %v4850_v44 = vld [vmem:[#allocation5 + $0x264] ss:$8 sps:$4 sm:$0xff]  }
  0xdf   :  { %3411 = vmatprep.subr.bf16.mxu0 %v4769_v45  ;;  %v4853_v45 = vld [vmem:[#allocation5 + $0x964] ss:$8 sps:$4 sm:$0xff]  }
  0xe1   :  { %3125 = vmatpush1.bf16.msra.mxu1 %v4764_v46  ;;  %v4848_v46 = vld [vmem:[#allocation5 + $0x260] ss:$8 sps:$4 sm:$0xff]  }
  0xe2   :  { %3412 = vmatpush1.bf16.msra.mxu0 %v4767_v47  ;;  %3126 = vmatprep.subr.bf16.mxu1 %v4772_v48  ;;  %v4851_v47 = vld [vmem:[#allocation5 + $0x960] ss:$8 sps:$4 sm:$0xff]   ;;  %v4856_v48 = vld [vmem:[#allocation5 + $0x274] ss:$8 sps:$4 sm:$0xff]  }
  0xe3   :  { %3413 = vmatprep.subr.bf16.mxu0 %v4775_v49  ;;  %v4859_v49 = vld [vmem:[#allocation5 + $0x974] ss:$8 sps:$4 sm:$0xff]  }
  0xe5   :  { %3127 = vmatpush1.bf16.msra.mxu1 %v4770_v50  ;;  %v4854_v50 = vld [vmem:[#allocation5 + $0x270] ss:$8 sps:$4 sm:$0xff]  }
  0xe6   :  { %3414 = vmatpush1.bf16.msra.mxu0 %v4773_v51  ;;  %3128 = vmatprep.subr.bf16.mxu1 %v4778_v52  ;;  %v4857_v51 = vld [vmem:[#allocation5 + $0x970] ss:$8 sps:$4 sm:$0xff]   ;;  %v4862_v52 = vld [vmem:[#allocation5 + $0x284] ss:$8 sps:$4 sm:$0xff]  }
  0xe7   :  { %3415 = vmatprep.subr.bf16.mxu0 %v4781_v53  ;;  %v4865_v53 = vld [vmem:[#allocation5 + $0x984] ss:$8 sps:$4 sm:$0xff]  }
  0xe9   :  { %3129 = vmatpush1.bf16.msra.mxu1 %v4776_v54  ;;  %v4860_v54 = vld [vmem:[#allocation5 + $0x280] ss:$8 sps:$4 sm:$0xff]  }
  0xea   :  { %3416 = vmatpush1.bf16.msra.mxu0 %v4779_v55  ;;  %3130 = vmatprep.subr.bf16.mxu1 %v4784_v56  ;;  %v4863_v55 = vld [vmem:[#allocation5 + $0x980] ss:$8 sps:$4 sm:$0xff]   ;;  %v4868_v56 = vld [vmem:[#allocation5 + $0x294] ss:$8 sps:$4 sm:$0xff]  }
  0xeb   :  { %3417 = vmatprep.subr.bf16.mxu0 %v4787_v57  ;;  %v4871_v57 = vld [vmem:[#allocation5 + $0x994] ss:$8 sps:$4 sm:$0xff]  }
  0xed   :  { %3131 = vmatpush1.bf16.msra.mxu1 %v4782_v58  ;;  %v4866_v58 = vld [vmem:[#allocation5 + $0x290] ss:$8 sps:$4 sm:$0xff]  }
  0xee   :  { %3418 = vmatpush1.bf16.msra.mxu0 %v4785_v59  ;;  %3132 = vmatprep.subr.bf16.mxu1 %v4790_v60  ;;  %v4869_v59 = vld [vmem:[#allocation5 + $0x990] ss:$8 sps:$4 sm:$0xff]   ;;  %v4874_v60 = vld [vmem:[#allocation5 + $0x2a4] ss:$8 sps:$4 sm:$0xff]  }
  0xef   :  { %3419 = vmatprep.subr.bf16.mxu0 %v4793_v61  ;;  %v4877_v61 = vld [vmem:[#allocation5 + $0x9a4] ss:$8 sps:$4 sm:$0xff]  }
  0xf1   :  { %3133 = vmatpush1.bf16.msra.mxu1 %v4788_v62  ;;  %v4872_v62 = vld [vmem:[#allocation5 + $0x2a0] ss:$8 sps:$4 sm:$0xff]  }
  0xf2   :  { %3420 = vmatpush1.bf16.msra.mxu0 %v4791_v63  ;;  %3134 = vmatprep.subr.bf16.mxu1 %v4796_v0  ;;  %v4875_v63 = vld [vmem:[#allocation5 + $0x9a0] ss:$8 sps:$4 sm:$0xff]   ;;  %v4880_v0 = vld [vmem:[#allocation5 + $0x2b4] ss:$8 sps:$4 sm:$0xff]  }
  0xf3   :  { %3421 = vmatprep.subr.bf16.mxu0 %v4799_v1  ;;  %v4883_v1 = vld [vmem:[#allocation5 + $0x9b4] ss:$8 sps:$4 sm:$0xff]  }
  0xf5   :  { %3135 = vmatpush1.bf16.msra.mxu1 %v4794_v2  ;;  %v4878_v2 = vld [vmem:[#allocation5 + $0x2b0] ss:$8 sps:$4 sm:$0xff]  }
  0xf6   :  { %3422 = vmatpush1.bf16.msra.mxu0 %v4797_v3  ;;  %3136 = vmatprep.subr.bf16.mxu1 %v4802_v4  ;;  %v4881_v3 = vld [vmem:[#allocation5 + $0x9b0] ss:$8 sps:$4 sm:$0xff]   ;;  %v4886_v4 = vld [vmem:[#allocation5 + $0x2c4] ss:$8 sps:$4 sm:$0xff]  }
  0xf7   :  { %3423 = vmatprep.subr.bf16.mxu0 %v4805_v5  ;;  %v4889_v5 = vld [vmem:[#allocation5 + $0x9c4] ss:$8 sps:$4 sm:$0xff]  }
  0xf9   :  { %3137 = vmatpush1.bf16.msra.mxu1 %v4800_v6  ;;  %v4884_v6 = vld [vmem:[#allocation5 + $0x2c0] ss:$8 sps:$4 sm:$0xff]  }
  0xfa   :  { %3424 = vmatpush1.bf16.msra.mxu0 %v4803_v7  ;;  %3138 = vmatprep.subr.bf16.mxu1 %v4808_v8  ;;  %v4887_v7 = vld [vmem:[#allocation5 + $0x9c0] ss:$8 sps:$4 sm:$0xff]   ;;  %v4892_v8 = vld [vmem:[#allocation5 + $0x2d4] ss:$8 sps:$4 sm:$0xff]  }
  0xfb   :  { %3425 = vmatprep.subr.bf16.mxu0 %v4811_v9  ;;  %v4895_v9 = vld [vmem:[#allocation5 + $0x9d4] ss:$8 sps:$4 sm:$0xff]  }
  0xfd   :  { %3139 = vmatpush1.bf16.msra.mxu1 %v4806_v10  ;;  %v4890_v10 = vld [vmem:[#allocation5 + $0x2d0] ss:$8 sps:$4 sm:$0xff]  }
  0xfe   :  { %3426 = vmatpush1.bf16.msra.mxu0 %v4809_v11  ;;  %3149 = vmatprep.subr.bf16.mxu1 %v4814_v12  ;;  %v4893_v11 = vld [vmem:[#allocation5 + $0x9d0] ss:$8 sps:$4 sm:$0xff]   ;;  %v4898_v12 = vld [vmem:[#allocation5 + $0x2e4] ss:$8 sps:$4 sm:$0xff]  }
  0xff   :  { %3436 = vmatprep.subr.bf16.mxu0 %v4817_v15  ;;  %v4899_v15 = vld [vmem:[#allocation5 + $0x9e0] ss:$8 sps:$4 sm:$0xff]  }
 0x100   :  { %3141 = vmatmul.mubr.bf16.vlgmr.msra.gmra.mrb[0].mxu1 %v147_v18  ;;  %v4902_v18 = vld [vmem:[#allocation5 + $0x2f0] ss:$8 sps:$4 sm:$0xff]  }
 0x101   :  { %3428 = vmatmul.mubr.bf16.vlgmr.msra.gmra.mrb[0].mxu0 %v161_v19  ;;  %3150 = vmatpush1.bf16.msra.mxu1 %v4812_v16  ;;  %v4904_v16 = vld [vmem:[#allocation5 + $0x2f4] ss:$8 sps:$4 sm:$0xff]   ;;  %v4905_v19 = vld [vmem:[#allocation5 + $0x9f0] ss:$8 sps:$4 sm:$0xff]  }
 0x102   :  { %3437 = vmatpush1.bf16.msra.mxu0 %v4815_v17  ;;  %3151 = vmatprep.subr.bf16.mxu1 %v4820_v20  ;;  %v4907_v17 = vld [vmem:[#allocation5 + $0x9f4] ss:$8 sps:$4 sm:$0xff]   ;;  %v4910_v20 = vld [vmem:[#allocation5 + $0x304] ss:$8 sps:$4 sm:$0xff]  }
 0x103   :  { %3438 = vmatprep.subr.bf16.mxu0 %v4823_v21  ;;  %3181 = vmatprep.mubr.bf16.mxu1 %v150_v24  ;;  %v119_v21 = vld [vmem:[#allocation2 + $0x20] sm:$0xff]  ;;  %v4908_v24 = vld [vmem:[#allocation5 + $0x300] ss:$8 sps:$4 sm:$0xff]  }
 0x104   :  { %3468 = vmatprep.mubr.bf16.mxu0 %v164_v29  ;;  %v149_v26 = vpack.c.bf16 %v119_v21, %v119_v21  ;;  %v136_v29 = vld [vmem:[#allocation2 + $0xa8] sm:$0xff]  ;;  %v4997_v21 = vld [vmem:[#allocation5 + $0xae4] ss:$8 sps:$4 sm:$0xff]  }
 0x105   :  { %3152 = vmatpush1.bf16.msra.mxu1 %v4818_v23  ;;  %v4913_v23 = vld [vmem:[#allocation5 + $0xa04] ss:$8 sps:$4 sm:$0xff]  }
 0x106   :  { %3439 = vmatpush1.bf16.msra.mxu0 %v4821_v25  ;;  %3153 = vmatprep.subr.bf16.mxu1 %v4826_v27  ;;  %v4911_v25 = vld [vmem:[#allocation5 + $0xa00] ss:$8 sps:$4 sm:$0xff]   ;;  %v163_v27 = vpack.c.bf16 %v133_v22, %v133_v22 }
 0x107   :  { %3440 = vmatprep.subr.bf16.mxu0 %v4829_v28  ;;  %v122_v28 = vld [vmem:[#allocation2 + $0x38] sm:$0xff] }
 0x108   :  { %v4992_v22 = vld [vmem:[#allocation5 + $0x3e0] ss:$8 sps:$4 sm:$0xff]  }
 0x109   :  { %3154 = vmatpush1.bf16.msra.mxu1 %v4824_v30  ;;  %v4916_v30 = vld [vmem:[#allocation5 + $0x314] ss:$8 sps:$4 sm:$0xff]  }
 0x10a   :  { %3441 = vmatpush1.bf16.msra.mxu0 %v4827_v31  ;;  %3155 = vmatprep.subr.bf16.mxu1 %v4832_v32  ;;  %v4919_v31 = vld [vmem:[#allocation5 + $0xa14] ss:$8 sps:$4 sm:$0xff]   ;;  %v152_v32 = vpack.c.bf16 %v122_v28, %v122_v28  ;;  %v5006_v28 = vld [vmem:[#allocation5 + $0x404] ss:$8 sps:$4 sm:$0xff]  }
 0x10b   :  { %3442 = vmatprep.subr.bf16.mxu0 %v4835_v33  ;;  %v166_v33 = vpack.c.bf16 %v136_v29, %v136_v29  ;;  %v121_v29 = vld [vmem:[#allocation2 + $0x30] sm:$0xff] }
 0x10d   :  { %3156 = vmatpush1.bf16.msra.mxu1 %v4830_v34  ;;  %v4914_v34 = vld [vmem:[#allocation5 + $0x310] ss:$8 sps:$4 sm:$0xff]  }
 0x10e   :  { %3443 = vmatpush1.bf16.msra.mxu0 %v4833_v35  ;;  %3157 = vmatprep.subr.bf16.mxu1 %v4838_v36  ;;  %v4917_v35 = vld [vmem:[#allocation5 + $0xa10] ss:$8 sps:$4 sm:$0xff]   ;;  %v4922_v36 = vld [vmem:[#allocation5 + $0x324] ss:$8 sps:$4 sm:$0xff]  }
 0x10f   :  { %3444 = vmatprep.subr.bf16.mxu0 %v4841_v37  ;;  %v4925_v37 = vld [vmem:[#allocation5 + $0xa24] ss:$8 sps:$4 sm:$0xff]  }
 0x111   :  { %3158 = vmatpush1.bf16.msra.mxu1 %v4836_v38  ;;  %v4920_v38 = vld [vmem:[#allocation5 + $0x320] ss:$8 sps:$4 sm:$0xff]  }
 0x112   :  { %3445 = vmatpush1.bf16.msra.mxu0 %v4839_v39  ;;  %3159 = vmatprep.subr.bf16.mxu1 %v4844_v40  ;;  %v4923_v39 = vld [vmem:[#allocation5 + $0xa20] ss:$8 sps:$4 sm:$0xff]   ;;  %v4928_v40 = vld [vmem:[#allocation5 + $0x334] ss:$8 sps:$4 sm:$0xff]  }
 0x113   :  { %3446 = vmatprep.subr.bf16.mxu0 %v4847_v41  ;;  %v4931_v41 = vld [vmem:[#allocation5 + $0xa34] ss:$8 sps:$4 sm:$0xff]  }
 0x115   :  { %3160 = vmatpush1.bf16.msra.mxu1 %v4842_v42  ;;  %v4926_v42 = vld [vmem:[#allocation5 + $0x330] ss:$8 sps:$4 sm:$0xff]  }
 0x116   :  { %3447 = vmatpush1.bf16.msra.mxu0 %v4845_v43  ;;  %3161 = vmatprep.subr.bf16.mxu1 %v4850_v44  ;;  %v4929_v43 = vld [vmem:[#allocation5 + $0xa30] ss:$8 sps:$4 sm:$0xff]   ;;  %v4934_v44 = vld [vmem:[#allocation5 + $0x344] ss:$8 sps:$4 sm:$0xff]  }
 0x117   :  { %3448 = vmatprep.subr.bf16.mxu0 %v4853_v45  ;;  %v4937_v45 = vld [vmem:[#allocation5 + $0xa44] ss:$8 sps:$4 sm:$0xff]  }
 0x119   :  { %3162 = vmatpush1.bf16.msra.mxu1 %v4848_v46  ;;  %v4932_v46 = vld [vmem:[#allocation5 + $0x340] ss:$8 sps:$4 sm:$0xff]  }
 0x11a   :  { %3449 = vmatpush1.bf16.msra.mxu0 %v4851_v47  ;;  %3163 = vmatprep.subr.bf16.mxu1 %v4856_v48  ;;  %v4935_v47 = vld [vmem:[#allocation5 + $0xa40] ss:$8 sps:$4 sm:$0xff]   ;;  %v4940_v48 = vld [vmem:[#allocation5 + $0x354] ss:$8 sps:$4 sm:$0xff]  }
 0x11b   :  { %3450 = vmatprep.subr.bf16.mxu0 %v4859_v49  ;;  %v4943_v49 = vld [vmem:[#allocation5 + $0xa54] ss:$8 sps:$4 sm:$0xff]  }
 0x11d   :  { %3164 = vmatpush1.bf16.msra.mxu1 %v4854_v50  ;;  %v4938_v50 = vld [vmem:[#allocation5 + $0x350] ss:$8 sps:$4 sm:$0xff]  }
 0x11e   :  { %3451 = vmatpush1.bf16.msra.mxu0 %v4857_v51  ;;  %3165 = vmatprep.subr.bf16.mxu1 %v4862_v52  ;;  %v4941_v51 = vld [vmem:[#allocation5 + $0xa50] ss:$8 sps:$4 sm:$0xff]   ;;  %v4946_v52 = vld [vmem:[#allocation5 + $0x364] ss:$8 sps:$4 sm:$0xff]  }
 0x11f   :  { %3452 = vmatprep.subr.bf16.mxu0 %v4865_v53  ;;  %v4949_v53 = vld [vmem:[#allocation5 + $0xa64] ss:$8 sps:$4 sm:$0xff]  }
 0x121   :  { %3166 = vmatpush1.bf16.msra.mxu1 %v4860_v54  ;;  %v4944_v54 = vld [vmem:[#allocation5 + $0x360] ss:$8 sps:$4 sm:$0xff]  }
 0x122   :  { %3453 = vmatpush1.bf16.msra.mxu0 %v4863_v55  ;;  %3167 = vmatprep.subr.bf16.mxu1 %v4868_v56  ;;  %v4947_v55 = vld [vmem:[#allocation5 + $0xa60] ss:$8 sps:$4 sm:$0xff]   ;;  %v4952_v56 = vld [vmem:[#allocation5 + $0x374] ss:$8 sps:$4 sm:$0xff]  }
 0x123   :  { %3454 = vmatprep.subr.bf16.mxu0 %v4871_v57  ;;  %v4955_v57 = vld [vmem:[#allocation5 + $0xa74] ss:$8 sps:$4 sm:$0xff]  }
 0x125   :  { %3168 = vmatpush1.bf16.msra.mxu1 %v4866_v58  ;;  %v4950_v58 = vld [vmem:[#allocation5 + $0x370] ss:$8 sps:$4 sm:$0xff]  }
 0x126   :  { %3455 = vmatpush1.bf16.msra.mxu0 %v4869_v59  ;;  %3169 = vmatprep.subr.bf16.mxu1 %v4874_v60  ;;  %v4953_v59 = vld [vmem:[#allocation5 + $0xa70] ss:$8 sps:$4 sm:$0xff]   ;;  %v4958_v60 = vld [vmem:[#allocation5 + $0x384] ss:$8 sps:$4 sm:$0xff]  }
 0x127   :  { %3456 = vmatprep.subr.bf16.mxu0 %v4877_v61  ;;  %v4961_v61 = vld [vmem:[#allocation5 + $0xa84] ss:$8 sps:$4 sm:$0xff]  }
 0x129   :  { %3170 = vmatpush1.bf16.msra.mxu1 %v4872_v62  ;;  %v4956_v62 = vld [vmem:[#allocation5 + $0x380] ss:$8 sps:$4 sm:$0xff]  }
 0x12a   :  { %3457 = vmatpush1.bf16.msra.mxu0 %v4875_v63  ;;  %3171 = vmatprep.subr.bf16.mxu1 %v4880_v0  ;;  %v4959_v63 = vld [vmem:[#allocation5 + $0xa80] ss:$8 sps:$4 sm:$0xff]   ;;  %v4964_v0 = vld [vmem:[#allocation5 + $0x394] ss:$8 sps:$4 sm:$0xff]  }
 0x12b   :  { %3458 = vmatprep.subr.bf16.mxu0 %v4883_v1  ;;  %v4967_v1 = vld [vmem:[#allocation5 + $0xa94] ss:$8 sps:$4 sm:$0xff]  }
 0x12d   :  { %3172 = vmatpush1.bf16.msra.mxu1 %v4878_v2  ;;  %v4962_v2 = vld [vmem:[#allocation5 + $0x390] ss:$8 sps:$4 sm:$0xff]  }
 0x12e   :  { %3459 = vmatpush1.bf16.msra.mxu0 %v4881_v3  ;;  %3173 = vmatprep.subr.bf16.mxu1 %v4886_v4  ;;  %v4965_v3 = vld [vmem:[#allocation5 + $0xa90] ss:$8 sps:$4 sm:$0xff]   ;;  %v4970_v4 = vld [vmem:[#allocation5 + $0x3a4] ss:$8 sps:$4 sm:$0xff]  }
 0x12f   :  { %3460 = vmatprep.subr.bf16.mxu0 %v4889_v5  ;;  %v4973_v5 = vld [vmem:[#allocation5 + $0xaa4] ss:$8 sps:$4 sm:$0xff]  }
 0x131   :  { %3174 = vmatpush1.bf16.msra.mxu1 %v4884_v6  ;;  %v4968_v6 = vld [vmem:[#allocation5 + $0x3a0] ss:$8 sps:$4 sm:$0xff]  }
 0x132   :  { %3461 = vmatpush1.bf16.msra.mxu0 %v4887_v7  ;;  %3175 = vmatprep.subr.bf16.mxu1 %v4892_v8  ;;  %v4971_v7 = vld [vmem:[#allocation5 + $0xaa0] ss:$8 sps:$4 sm:$0xff]   ;;  %v4976_v8 = vld [vmem:[#allocation5 + $0x3b4] ss:$8 sps:$4 sm:$0xff]  }
 0x133   :  { %3462 = vmatprep.subr.bf16.mxu0 %v4895_v9  ;;  %v4979_v9 = vld [vmem:[#allocation5 + $0xab4] ss:$8 sps:$4 sm:$0xff]  }
 0x135   :  { %3176 = vmatpush1.bf16.msra.mxu1 %v4890_v10  ;;  %v4974_v10 = vld [vmem:[#allocation5 + $0x3b0] ss:$8 sps:$4 sm:$0xff]  }
 0x136   :  { %3463 = vmatpush1.bf16.msra.mxu0 %v4893_v11  ;;  %3177 = vmatprep.subr.bf16.mxu1 %v4898_v12  ;;  %v4977_v11 = vld [vmem:[#allocation5 + $0xab0] ss:$8 sps:$4 sm:$0xff]   ;;  %v4982_v12 = vld [vmem:[#allocation5 + $0x3c4] ss:$8 sps:$4 sm:$0xff]  }
 0x137   :  { %3464 = vmatprep.subr.bf16.mxu0 %v4901_v13  ;;  %v4985_v13 = vld [vmem:[#allocation5 + $0xac4] ss:$8 sps:$4 sm:$0xff]  }
 0x139   :  { %3178 = vmatpush1.bf16.msra.mxu1 %v4896_v14  ;;  %v4980_v14 = vld [vmem:[#allocation5 + $0x3c0] ss:$8 sps:$4 sm:$0xff]  }
 0x13a   :  { %3465 = vmatpush1.bf16.msra.mxu0 %v4899_v15  ;;  %3179 = vmatprep.subr.bf16.mxu1 %v4904_v16  ;;  %v4983_v15 = vld [vmem:[#allocation5 + $0xac0] ss:$8 sps:$4 sm:$0xff]   ;;  %v4988_v16 = vld [vmem:[#allocation5 + $0x3d4] ss:$8 sps:$4 sm:$0xff]  }
 0x13b   :  { %3466 = vmatprep.subr.bf16.mxu0 %v4907_v17  ;;  %v4991_v17 = vld [vmem:[#allocation5 + $0xad4] ss:$8 sps:$4 sm:$0xff]  }
 0x13d   :  { %3180 = vmatpush1.bf16.msra.mxu1 %v4902_v18  ;;  %v4986_v18 = vld [vmem:[#allocation5 + $0x3d0] ss:$8 sps:$4 sm:$0xff]  }
 0x13e   :  { %3467 = vmatpush1.bf16.msra.mxu0 %v4905_v19  ;;  %3190 = vmatprep.subr.bf16.mxu1 %v4910_v20  ;;  %v4989_v19 = vld [vmem:[#allocation5 + $0xad0] ss:$8 sps:$4 sm:$0xff]   ;;  %v4994_v20 = vld [vmem:[#allocation5 + $0x3e4] ss:$8 sps:$4 sm:$0xff]  }
 0x13f   :  { %3477 = vmatprep.subr.bf16.mxu0 %v4913_v23  ;;  %v4995_v23 = vld [vmem:[#allocation5 + $0xae0] ss:$8 sps:$4 sm:$0xff]  }
 0x140   :  { %3182 = vmatmul.mubr.bf16.vlgmr.msra.gmra.mrb[0].mxu1 %v149_v26  ;;  %v4998_v26 = vld [vmem:[#allocation5 + $0x3f0] ss:$8 sps:$4 sm:$0xff]  }
 0x141   :  { %3469 = vmatmul.mubr.bf16.vlgmr.msra.gmra.mrb[0].mxu0 %v163_v27  ;;  %3191 = vmatpush1.bf16.msra.mxu1 %v4908_v24  ;;  %v5000_v24 = vld [vmem:[#allocation5 + $0x3f4] ss:$8 sps:$4 sm:$0xff]   ;;  %v5001_v27 = vld [vmem:[#allocation5 + $0xaf0] ss:$8 sps:$4 sm:$0xff]  }
 0x142   :  { %3478 = vmatpush1.bf16.msra.mxu0 %v4911_v25  ;;  %3192 = vmatprep.subr.bf16.mxu1 %v4916_v30  ;;  %v5003_v25 = vld [vmem:[#allocation5 + $0xaf4] ss:$8 sps:$4 sm:$0xff]  }
 0x143   :  { %3479 = vmatprep.subr.bf16.mxu0 %v4919_v31  ;;  %3222 = vmatprep.mubr.bf16.mxu1 %v152_v32  ;;  %v135_v30 = vld [vmem:[#allocation2 + $0xa0] sm:$0xff]  ;;  %v5009_v31 = vld [vmem:[#allocation5 + $0xb04] ss:$8 sps:$4 sm:$0xff]   ;;  %v5004_v32 = vld [vmem:[#allocation5 + $0x400] ss:$8 sps:$4 sm:$0xff]  }
 0x144   :  { %3509 = vmatprep.mubr.bf16.mxu0 %v166_v33  ;;  %v5007_v33 = vld [vmem:[#allocation5 + $0xb00] ss:$8 sps:$4 sm:$0xff]  }
 0x145   :  { %3193 = vmatpush1.bf16.msra.mxu1 %v4914_v34  ;;  %v151_v34 = vpack.c.bf16 %v121_v29, %v121_v29  ;;  %v5093_v29 = vld [vmem:[#allocation5 + $0xbe4] ss:$8 sps:$4 sm:$0xff]  }
 0x146   :  { %3480 = vmatpush1.bf16.msra.mxu0 %v4917_v35  ;;  %3194 = vmatprep.subr.bf16.mxu1 %v4922_v36  ;;  %v165_v35 = vpack.c.bf16 %v135_v30, %v135_v30  ;;  %v124_v36 = vld [vmem:[#allocation2 + $0x48] sm:$0xff]  ;;  %v5088_v30 = vld [vmem:[#allocation5 + $0x4e0] ss:$8 sps:$4 sm:$0xff]  }
 0x147   :  { %3481 = vmatprep.subr.bf16.mxu0 %v4925_v37  ;;  %v138_v37 = vld [vmem:[#allocation2 + $0xb8] sm:$0xff] }
 0x149   :  { %3195 = vmatpush1.bf16.msra.mxu1 %v4920_v38  ;;  %v5012_v38 = vld [vmem:[#allocation5 + $0x414] ss:$8 sps:$4 sm:$0xff]  }
 0x14a   :  { %3482 = vmatpush1.bf16.msra.mxu0 %v4923_v39  ;;  %3196 = vmatprep.subr.bf16.mxu1 %v4928_v40  ;;  %v5015_v39 = vld [vmem:[#allocation5 + $0xb14] ss:$8 sps:$4 sm:$0xff]   ;;  %v154_v40 = vpack.c.bf16 %v124_v36, %v124_v36  ;;  %v5102_v36 = vld [vmem:[#allocation5 + $0x504] ss:$8 sps:$4 sm:$0xff]  }
 0x14b   :  { %3483 = vmatprep.subr.bf16.mxu0 %v4931_v41  ;;  %v168_v41 = vpack.c.bf16 %v138_v37, %v138_v37  ;;  %v123_v37 = vld [vmem:[#allocation2 + $0x40] sm:$0xff] }
 0x14d   :  { %3197 = vmatpush1.bf16.msra.mxu1 %v4926_v42  ;;  %v5010_v42 = vld [vmem:[#allocation5 + $0x410] ss:$8 sps:$4 sm:$0xff]  }
 0x14e   :  { %3484 = vmatpush1.bf16.msra.mxu0 %v4929_v43  ;;  %3198 = vmatprep.subr.bf16.mxu1 %v4934_v44  ;;  %v5013_v43 = vld [vmem:[#allocation5 + $0xb10] ss:$8 sps:$4 sm:$0xff]   ;;  %v5018_v44 = vld [vmem:[#allocation5 + $0x424] ss:$8 sps:$4 sm:$0xff]  }
 0x14f   :  { %3485 = vmatprep.subr.bf16.mxu0 %v4937_v45  ;;  %v5021_v45 = vld [vmem:[#allocation5 + $0xb24] ss:$8 sps:$4 sm:$0xff]  }
 0x151   :  { %3199 = vmatpush1.bf16.msra.mxu1 %v4932_v46  ;;  %v5016_v46 = vld [vmem:[#allocation5 + $0x420] ss:$8 sps:$4 sm:$0xff]  }
 0x152   :  { %3486 = vmatpush1.bf16.msra.mxu0 %v4935_v47  ;;  %3200 = vmatprep.subr.bf16.mxu1 %v4940_v48  ;;  %v5019_v47 = vld [vmem:[#allocation5 + $0xb20] ss:$8 sps:$4 sm:$0xff]   ;;  %v5024_v48 = vld [vmem:[#allocation5 + $0x434] ss:$8 sps:$4 sm:$0xff]  }
 0x153   :  { %3487 = vmatprep.subr.bf16.mxu0 %v4943_v49  ;;  %v5027_v49 = vld [vmem:[#allocation5 + $0xb34] ss:$8 sps:$4 sm:$0xff]  }
 0x155   :  { %3201 = vmatpush1.bf16.msra.mxu1 %v4938_v50  ;;  %v5022_v50 = vld [vmem:[#allocation5 + $0x430] ss:$8 sps:$4 sm:$0xff]  }
 0x156   :  { %3488 = vmatpush1.bf16.msra.mxu0 %v4941_v51  ;;  %3202 = vmatprep.subr.bf16.mxu1 %v4946_v52  ;;  %v5025_v51 = vld [vmem:[#allocation5 + $0xb30] ss:$8 sps:$4 sm:$0xff]   ;;  %v5030_v52 = vld [vmem:[#allocation5 + $0x444] ss:$8 sps:$4 sm:$0xff]  }
 0x157   :  { %3489 = vmatprep.subr.bf16.mxu0 %v4949_v53  ;;  %v5033_v53 = vld [vmem:[#allocation5 + $0xb44] ss:$8 sps:$4 sm:$0xff]  }
 0x159   :  { %3203 = vmatpush1.bf16.msra.mxu1 %v4944_v54  ;;  %v5028_v54 = vld [vmem:[#allocation5 + $0x440] ss:$8 sps:$4 sm:$0xff]  }
 0x15a   :  { %3490 = vmatpush1.bf16.msra.mxu0 %v4947_v55  ;;  %3204 = vmatprep.subr.bf16.mxu1 %v4952_v56  ;;  %v5031_v55 = vld [vmem:[#allocation5 + $0xb40] ss:$8 sps:$4 sm:$0xff]   ;;  %v5036_v56 = vld [vmem:[#allocation5 + $0x454] ss:$8 sps:$4 sm:$0xff]  }
 0x15b   :  { %3491 = vmatprep.subr.bf16.mxu0 %v4955_v57  ;;  %v5039_v57 = vld [vmem:[#allocation5 + $0xb54] ss:$8 sps:$4 sm:$0xff]  }
 0x15d   :  { %3205 = vmatpush1.bf16.msra.mxu1 %v4950_v58  ;;  %v5034_v58 = vld [vmem:[#allocation5 + $0x450] ss:$8 sps:$4 sm:$0xff]  }
 0x15e   :  { %3492 = vmatpush1.bf16.msra.mxu0 %v4953_v59  ;;  %3206 = vmatprep.subr.bf16.mxu1 %v4958_v60  ;;  %v5037_v59 = vld [vmem:[#allocation5 + $0xb50] ss:$8 sps:$4 sm:$0xff]   ;;  %v5042_v60 = vld [vmem:[#allocation5 + $0x464] ss:$8 sps:$4 sm:$0xff]  }
 0x15f   :  { %3493 = vmatprep.subr.bf16.mxu0 %v4961_v61  ;;  %v5045_v61 = vld [vmem:[#allocation5 + $0xb64] ss:$8 sps:$4 sm:$0xff]  }
 0x161   :  { %3207 = vmatpush1.bf16.msra.mxu1 %v4956_v62  ;;  %v5040_v62 = vld [vmem:[#allocation5 + $0x460] ss:$8 sps:$4 sm:$0xff]  }
 0x162   :  { %3494 = vmatpush1.bf16.msra.mxu0 %v4959_v63  ;;  %3208 = vmatprep.subr.bf16.mxu1 %v4964_v0  ;;  %v5043_v63 = vld [vmem:[#allocation5 + $0xb60] ss:$8 sps:$4 sm:$0xff]   ;;  %v5048_v0 = vld [vmem:[#allocation5 + $0x474] ss:$8 sps:$4 sm:$0xff]  }
 0x163   :  { %3495 = vmatprep.subr.bf16.mxu0 %v4967_v1  ;;  %v5051_v1 = vld [vmem:[#allocation5 + $0xb74] ss:$8 sps:$4 sm:$0xff]  }
 0x165   :  { %3209 = vmatpush1.bf16.msra.mxu1 %v4962_v2  ;;  %v5046_v2 = vld [vmem:[#allocation5 + $0x470] ss:$8 sps:$4 sm:$0xff]  }
 0x166   :  { %3496 = vmatpush1.bf16.msra.mxu0 %v4965_v3  ;;  %3210 = vmatprep.subr.bf16.mxu1 %v4970_v4  ;;  %v5049_v3 = vld [vmem:[#allocation5 + $0xb70] ss:$8 sps:$4 sm:$0xff]   ;;  %v5054_v4 = vld [vmem:[#allocation5 + $0x484] ss:$8 sps:$4 sm:$0xff]  }
 0x167   :  { %3497 = vmatprep.subr.bf16.mxu0 %v4973_v5  ;;  %v5057_v5 = vld [vmem:[#allocation5 + $0xb84] ss:$8 sps:$4 sm:$0xff]  }
 0x169   :  { %3211 = vmatpush1.bf16.msra.mxu1 %v4968_v6  ;;  %v5052_v6 = vld [vmem:[#allocation5 + $0x480] ss:$8 sps:$4 sm:$0xff]  }
 0x16a   :  { %3498 = vmatpush1.bf16.msra.mxu0 %v4971_v7  ;;  %3212 = vmatprep.subr.bf16.mxu1 %v4976_v8  ;;  %v5055_v7 = vld [vmem:[#allocation5 + $0xb80] ss:$8 sps:$4 sm:$0xff]   ;;  %v5060_v8 = vld [vmem:[#allocation5 + $0x494] ss:$8 sps:$4 sm:$0xff]  }
 0x16b   :  { %3499 = vmatprep.subr.bf16.mxu0 %v4979_v9  ;;  %v5063_v9 = vld [vmem:[#allocation5 + $0xb94] ss:$8 sps:$4 sm:$0xff]  }
 0x16d   :  { %3213 = vmatpush1.bf16.msra.mxu1 %v4974_v10  ;;  %v5058_v10 = vld [vmem:[#allocation5 + $0x490] ss:$8 sps:$4 sm:$0xff]  }
 0x16e   :  { %3500 = vmatpush1.bf16.msra.mxu0 %v4977_v11  ;;  %3214 = vmatprep.subr.bf16.mxu1 %v4982_v12  ;;  %v5061_v11 = vld [vmem:[#allocation5 + $0xb90] ss:$8 sps:$4 sm:$0xff]   ;;  %v5066_v12 = vld [vmem:[#allocation5 + $0x4a4] ss:$8 sps:$4 sm:$0xff]  }
 0x16f   :  { %3501 = vmatprep.subr.bf16.mxu0 %v4985_v13  ;;  %v5069_v13 = vld [vmem:[#allocation5 + $0xba4] ss:$8 sps:$4 sm:$0xff]  }
 0x171   :  { %3215 = vmatpush1.bf16.msra.mxu1 %v4980_v14  ;;  %v5064_v14 = vld [vmem:[#allocation5 + $0x4a0] ss:$8 sps:$4 sm:$0xff]  }
 0x172   :  { %3502 = vmatpush1.bf16.msra.mxu0 %v4983_v15  ;;  %3216 = vmatprep.subr.bf16.mxu1 %v4988_v16  ;;  %v5067_v15 = vld [vmem:[#allocation5 + $0xba0] ss:$8 sps:$4 sm:$0xff]   ;;  %v5072_v16 = vld [vmem:[#allocation5 + $0x4b4] ss:$8 sps:$4 sm:$0xff]  }
 0x173   :  { %3503 = vmatprep.subr.bf16.mxu0 %v4991_v17  ;;  %v5075_v17 = vld [vmem:[#allocation5 + $0xbb4] ss:$8 sps:$4 sm:$0xff]  }
 0x175   :  { %3217 = vmatpush1.bf16.msra.mxu1 %v4986_v18  ;;  %v5070_v18 = vld [vmem:[#allocation5 + $0x4b0] ss:$8 sps:$4 sm:$0xff]  }
 0x176   :  { %3504 = vmatpush1.bf16.msra.mxu0 %v4989_v19  ;;  %3218 = vmatprep.subr.bf16.mxu1 %v4994_v20  ;;  %v5073_v19 = vld [vmem:[#allocation5 + $0xbb0] ss:$8 sps:$4 sm:$0xff]   ;;  %v5078_v20 = vld [vmem:[#allocation5 + $0x4c4] ss:$8 sps:$4 sm:$0xff]  }
 0x177   :  { %3505 = vmatprep.subr.bf16.mxu0 %v4997_v21  ;;  %v5081_v21 = vld [vmem:[#allocation5 + $0xbc4] ss:$8 sps:$4 sm:$0xff]  }
 0x179   :  { %3219 = vmatpush1.bf16.msra.mxu1 %v4992_v22  ;;  %v5076_v22 = vld [vmem:[#allocation5 + $0x4c0] ss:$8 sps:$4 sm:$0xff]  }
 0x17a   :  { %3506 = vmatpush1.bf16.msra.mxu0 %v4995_v23  ;;  %3220 = vmatprep.subr.bf16.mxu1 %v5000_v24  ;;  %v5079_v23 = vld [vmem:[#allocation5 + $0xbc0] ss:$8 sps:$4 sm:$0xff]   ;;  %v5084_v24 = vld [vmem:[#allocation5 + $0x4d4] ss:$8 sps:$4 sm:$0xff]  }
 0x17b   :  { %3507 = vmatprep.subr.bf16.mxu0 %v5003_v25  ;;  %v5087_v25 = vld [vmem:[#allocation5 + $0xbd4] ss:$8 sps:$4 sm:$0xff]  }
 0x17d   :  { %3221 = vmatpush1.bf16.msra.mxu1 %v4998_v26  ;;  %v5082_v26 = vld [vmem:[#allocation5 + $0x4d0] ss:$8 sps:$4 sm:$0xff]  }
 0x17e   :  { %3508 = vmatpush1.bf16.msra.mxu0 %v5001_v27  ;;  %3231 = vmatprep.subr.bf16.mxu1 %v5006_v28  ;;  %v5085_v27 = vld [vmem:[#allocation5 + $0xbd0] ss:$8 sps:$4 sm:$0xff]   ;;  %v5090_v28 = vld [vmem:[#allocation5 + $0x4e4] ss:$8 sps:$4 sm:$0xff]  }
 0x17f   :  { %3518 = vmatprep.subr.bf16.mxu0 %v5009_v31  ;;  %v5091_v31 = vld [vmem:[#allocation5 + $0xbe0] ss:$8 sps:$4 sm:$0xff]  }
 0x180   :  { %3223 = vmatmul.mubr.bf16.vlgmr.msra.gmra.mrb[0].mxu1 %v151_v34  ;;  %v5094_v34 = vld [vmem:[#allocation5 + $0x4f0] ss:$8 sps:$4 sm:$0xff]  }
 0x181   :  { %3510 = vmatmul.mubr.bf16.vlgmr.msra.gmra.mrb[0].mxu0 %v165_v35  ;;  %3232 = vmatpush1.bf16.msra.mxu1 %v5004_v32  ;;  %v5096_v32 = vld [vmem:[#allocation5 + $0x4f4] ss:$8 sps:$4 sm:$0xff]   ;;  %v5097_v35 = vld [vmem:[#allocation5 + $0xbf0] ss:$8 sps:$4 sm:$0xff]  }
 0x182   :  { %3519 = vmatpush1.bf16.msra.mxu0 %v5007_v33  ;;  %3233 = vmatprep.subr.bf16.mxu1 %v5012_v38  ;;  %v5099_v33 = vld [vmem:[#allocation5 + $0xbf4] ss:$8 sps:$4 sm:$0xff]   ;;  %v137_v38 = vld [vmem:[#allocation2 + $0xb0] sm:$0xff] }
 0x183   :  { %3520 = vmatprep.subr.bf16.mxu0 %v5015_v39  ;;  %3263 = vmatprep.mubr.bf16.mxu1 %v154_v40  ;;  %v5105_v39 = vld [vmem:[#allocation5 + $0xc04] ss:$8 sps:$4 sm:$0xff]  }
 0x184   :  { %3550 = vmatprep.mubr.bf16.mxu0 %v168_v41  ;;  %v126_v40 = vld [vmem:[#allocation2 + $0x58] sm:$0xff]  ;;  %v153_v41 = vpack.c.bf16 %v123_v37, %v123_v37 }
 0x185   :  { %3234 = vmatpush1.bf16.msra.mxu1 %v5010_v42  ;;  %v167_v42 = vpack.c.bf16 %v137_v38, %v137_v38  ;;  %v5189_v37 = vld [vmem:[#allocation5 + $0xce4] ss:$8 sps:$4 sm:$0xff]   ;;  %v5184_v38 = vld [vmem:[#allocation5 + $0x5e0] ss:$8 sps:$4 sm:$0xff]  }
 0x186   :  { %3521 = vmatpush1.bf16.msra.mxu0 %v5013_v43  ;;  %3235 = vmatprep.subr.bf16.mxu1 %v5018_v44  ;;  %v140_v43 = vld [vmem:[#allocation2 + $0xc8] sm:$0xff]  ;;  %v5100_v44 = vld [vmem:[#allocation5 + $0x500] ss:$8 sps:$4 sm:$0xff]  }
 0x187   :  { %3522 = vmatprep.subr.bf16.mxu0 %v5021_v45  ;;  %v5103_v45 = vld [vmem:[#allocation5 + $0xc00] ss:$8 sps:$4 sm:$0xff]  }
 0x189   :  { %3236 = vmatpush1.bf16.msra.mxu1 %v5016_v46  ;;  %v5108_v46 = vld [vmem:[#allocation5 + $0x514] ss:$8 sps:$4 sm:$0xff]  }
 0x18a   :  { %3523 = vmatpush1.bf16.msra.mxu0 %v5019_v47  ;;  %3237 = vmatprep.subr.bf16.mxu1 %v5024_v48  ;;  %v5111_v47 = vld [vmem:[#allocation5 + $0xc14] ss:$8 sps:$4 sm:$0xff]   ;;  %v5106_v48 = vld [vmem:[#allocation5 + $0x510] ss:$8 sps:$4 sm:$0xff]  }
 0x18b   :  { %3524 = vmatprep.subr.bf16.mxu0 %v5027_v49  ;;  %v5109_v49 = vld [vmem:[#allocation5 + $0xc10] ss:$8 sps:$4 sm:$0xff]  }
 0x18d   :  { %3238 = vmatpush1.bf16.msra.mxu1 %v5022_v50  ;;  %v156_v50 = vpack.c.bf16 %v126_v40, %v126_v40  ;;  %v5192_v40 = vld [vmem:[#allocation5 + $0x5f4] ss:$8 sps:$4 sm:$0xff]  }
 0x18e   :  { %3525 = vmatpush1.bf16.msra.mxu0 %v5025_v51  ;;  %3239 = vmatprep.subr.bf16.mxu1 %v5030_v52  ;;  %v170_v51 = vpack.c.bf16 %v140_v43, %v140_v43  ;;  %v5114_v52 = vld [vmem:[#allocation5 + $0x524] ss:$8 sps:$4 sm:$0xff]   ;;  %v5193_v43 = vld [vmem:[#allocation5 + $0xcf0] ss:$8 sps:$4 sm:$0xff]  }
 0x18f   :  { %3526 = vmatprep.subr.bf16.mxu0 %v5033_v53  ;;  %v5117_v53 = vld [vmem:[#allocation5 + $0xc24] ss:$8 sps:$4 sm:$0xff]  }
 0x191   :  { %3240 = vmatpush1.bf16.msra.mxu1 %v5028_v54  ;;  %v5112_v54 = vld [vmem:[#allocation5 + $0x520] ss:$8 sps:$4 sm:$0xff]  }
 0x192   :  { %3527 = vmatpush1.bf16.msra.mxu0 %v5031_v55  ;;  %3241 = vmatprep.subr.bf16.mxu1 %v5036_v56  ;;  %v5115_v55 = vld [vmem:[#allocation5 + $0xc20] ss:$8 sps:$4 sm:$0xff]   ;;  %v5120_v56 = vld [vmem:[#allocation5 + $0x534] ss:$8 sps:$4 sm:$0xff]  }
 0x193   :  { %3528 = vmatprep.subr.bf16.mxu0 %v5039_v57  ;;  %v5123_v57 = vld [vmem:[#allocation5 + $0xc34] ss:$8 sps:$4 sm:$0xff]  }
 0x195   :  { %3242 = vmatpush1.bf16.msra.mxu1 %v5034_v58  ;;  %v5118_v58 = vld [vmem:[#allocation5 + $0x530] ss:$8 sps:$4 sm:$0xff]  }
 0x196   :  { %3529 = vmatpush1.bf16.msra.mxu0 %v5037_v59  ;;  %3243 = vmatprep.subr.bf16.mxu1 %v5042_v60  ;;  %v5121_v59 = vld [vmem:[#allocation5 + $0xc30] ss:$8 sps:$4 sm:$0xff]   ;;  %v5126_v60 = vld [vmem:[#allocation5 + $0x544] ss:$8 sps:$4 sm:$0xff]  }
 0x197   :  { %3530 = vmatprep.subr.bf16.mxu0 %v5045_v61  ;;  %v5129_v61 = vld [vmem:[#allocation5 + $0xc44] ss:$8 sps:$4 sm:$0xff]  }
 0x199   :  { %3244 = vmatpush1.bf16.msra.mxu1 %v5040_v62  ;;  %v5124_v62 = vld [vmem:[#allocation5 + $0x540] ss:$8 sps:$4 sm:$0xff]  }
 0x19a   :  { %3531 = vmatpush1.bf16.msra.mxu0 %v5043_v63  ;;  %3245 = vmatprep.subr.bf16.mxu1 %v5048_v0  ;;  %v5127_v63 = vld [vmem:[#allocation5 + $0xc40] ss:$8 sps:$4 sm:$0xff]   ;;  %v5132_v0 = vld [vmem:[#allocation5 + $0x554] ss:$8 sps:$4 sm:$0xff]  }
 0x19b   :  { %3532 = vmatprep.subr.bf16.mxu0 %v5051_v1  ;;  %v5135_v1 = vld [vmem:[#allocation5 + $0xc54] ss:$8 sps:$4 sm:$0xff]  }
 0x19d   :  { %3246 = vmatpush1.bf16.msra.mxu1 %v5046_v2  ;;  %v5130_v2 = vld [vmem:[#allocation5 + $0x550] ss:$8 sps:$4 sm:$0xff]  }
 0x19e   :  { %3533 = vmatpush1.bf16.msra.mxu0 %v5049_v3  ;;  %3247 = vmatprep.subr.bf16.mxu1 %v5054_v4  ;;  %v5133_v3 = vld [vmem:[#allocation5 + $0xc50] ss:$8 sps:$4 sm:$0xff]   ;;  %v5138_v4 = vld [vmem:[#allocation5 + $0x564] ss:$8 sps:$4 sm:$0xff]  }
 0x19f   :  { %3534 = vmatprep.subr.bf16.mxu0 %v5057_v5  ;;  %v5141_v5 = vld [vmem:[#allocation5 + $0xc64] ss:$8 sps:$4 sm:$0xff]  }
 0x1a1   :  { %3248 = vmatpush1.bf16.msra.mxu1 %v5052_v6  ;;  %v5136_v6 = vld [vmem:[#allocation5 + $0x560] ss:$8 sps:$4 sm:$0xff]  }
 0x1a2   :  { %3535 = vmatpush1.bf16.msra.mxu0 %v5055_v7  ;;  %3249 = vmatprep.subr.bf16.mxu1 %v5060_v8  ;;  %v5139_v7 = vld [vmem:[#allocation5 + $0xc60] ss:$8 sps:$4 sm:$0xff]   ;;  %v5144_v8 = vld [vmem:[#allocation5 + $0x574] ss:$8 sps:$4 sm:$0xff]  }
 0x1a3   :  { %3536 = vmatprep.subr.bf16.mxu0 %v5063_v9  ;;  %v5147_v9 = vld [vmem:[#allocation5 + $0xc74] ss:$8 sps:$4 sm:$0xff]  }
 0x1a5   :  { %3250 = vmatpush1.bf16.msra.mxu1 %v5058_v10  ;;  %v5142_v10 = vld [vmem:[#allocation5 + $0x570] ss:$8 sps:$4 sm:$0xff]  }
 0x1a6   :  { %3537 = vmatpush1.bf16.msra.mxu0 %v5061_v11  ;;  %3251 = vmatprep.subr.bf16.mxu1 %v5066_v12  ;;  %v5145_v11 = vld [vmem:[#allocation5 + $0xc70] ss:$8 sps:$4 sm:$0xff]   ;;  %v5150_v12 = vld [vmem:[#allocation5 + $0x584] ss:$8 sps:$4 sm:$0xff]  }
 0x1a7   :  { %3538 = vmatprep.subr.bf16.mxu0 %v5069_v13  ;;  %v5153_v13 = vld [vmem:[#allocation5 + $0xc84] ss:$8 sps:$4 sm:$0xff]  }
 0x1a9   :  { %3252 = vmatpush1.bf16.msra.mxu1 %v5064_v14  ;;  %v5148_v14 = vld [vmem:[#allocation5 + $0x580] ss:$8 sps:$4 sm:$0xff]  }
 0x1aa   :  { %3539 = vmatpush1.bf16.msra.mxu0 %v5067_v15  ;;  %3253 = vmatprep.subr.bf16.mxu1 %v5072_v16  ;;  %v5151_v15 = vld [vmem:[#allocation5 + $0xc80] ss:$8 sps:$4 sm:$0xff]   ;;  %v5156_v16 = vld [vmem:[#allocation5 + $0x594] ss:$8 sps:$4 sm:$0xff]  }
 0x1ab   :  { %3540 = vmatprep.subr.bf16.mxu0 %v5075_v17  ;;  %v5159_v17 = vld [vmem:[#allocation5 + $0xc94] ss:$8 sps:$4 sm:$0xff]  }
 0x1ad   :  { %3254 = vmatpush1.bf16.msra.mxu1 %v5070_v18  ;;  %v5154_v18 = vld [vmem:[#allocation5 + $0x590] ss:$8 sps:$4 sm:$0xff]  }
 0x1ae   :  { %3541 = vmatpush1.bf16.msra.mxu0 %v5073_v19  ;;  %3255 = vmatprep.subr.bf16.mxu1 %v5078_v20  ;;  %v5157_v19 = vld [vmem:[#allocation5 + $0xc90] ss:$8 sps:$4 sm:$0xff]   ;;  %v5162_v20 = vld [vmem:[#allocation5 + $0x5a4] ss:$8 sps:$4 sm:$0xff]  }
 0x1af   :  { %3542 = vmatprep.subr.bf16.mxu0 %v5081_v21  ;;  %v5165_v21 = vld [vmem:[#allocation5 + $0xca4] ss:$8 sps:$4 sm:$0xff]  }
 0x1b1   :  { %3256 = vmatpush1.bf16.msra.mxu1 %v5076_v22  ;;  %v5160_v22 = vld [vmem:[#allocation5 + $0x5a0] ss:$8 sps:$4 sm:$0xff]  }
 0x1b2   :  { %3543 = vmatpush1.bf16.msra.mxu0 %v5079_v23  ;;  %3257 = vmatprep.subr.bf16.mxu1 %v5084_v24  ;;  %v5163_v23 = vld [vmem:[#allocation5 + $0xca0] ss:$8 sps:$4 sm:$0xff]   ;;  %v5168_v24 = vld [vmem:[#allocation5 + $0x5b4] ss:$8 sps:$4 sm:$0xff]  }
 0x1b3   :  { %3544 = vmatprep.subr.bf16.mxu0 %v5087_v25  ;;  %v5171_v25 = vld [vmem:[#allocation5 + $0xcb4] ss:$8 sps:$4 sm:$0xff]  }
 0x1b5   :  { %3258 = vmatpush1.bf16.msra.mxu1 %v5082_v26  ;;  %v5166_v26 = vld [vmem:[#allocation5 + $0x5b0] ss:$8 sps:$4 sm:$0xff]  }
 0x1b6   :  { %3545 = vmatpush1.bf16.msra.mxu0 %v5085_v27  ;;  %3259 = vmatprep.subr.bf16.mxu1 %v5090_v28  ;;  %v5169_v27 = vld [vmem:[#allocation5 + $0xcb0] ss:$8 sps:$4 sm:$0xff]   ;;  %v5174_v28 = vld [vmem:[#allocation5 + $0x5c4] ss:$8 sps:$4 sm:$0xff]  }
 0x1b7   :  { %3546 = vmatprep.subr.bf16.mxu0 %v5093_v29  ;;  %v5177_v29 = vld [vmem:[#allocation5 + $0xcc4] ss:$8 sps:$4 sm:$0xff]  }
 0x1b9   :  { %3260 = vmatpush1.bf16.msra.mxu1 %v5088_v30  ;;  %v5172_v30 = vld [vmem:[#allocation5 + $0x5c0] ss:$8 sps:$4 sm:$0xff]  }
 0x1ba   :  { %3547 = vmatpush1.bf16.msra.mxu0 %v5091_v31  ;;  %3261 = vmatprep.subr.bf16.mxu1 %v5096_v32  ;;  %v5175_v31 = vld [vmem:[#allocation5 + $0xcc0] ss:$8 sps:$4 sm:$0xff]   ;;  %v5180_v32 = vld [vmem:[#allocation5 + $0x5d4] ss:$8 sps:$4 sm:$0xff]  }
 0x1bb   :  { %3548 = vmatprep.subr.bf16.mxu0 %v5099_v33  ;;  %v5183_v33 = vld [vmem:[#allocation5 + $0xcd4] ss:$8 sps:$4 sm:$0xff]  }
 0x1bd   :  { %3262 = vmatpush1.bf16.msra.mxu1 %v5094_v34  ;;  %v5178_v34 = vld [vmem:[#allocation5 + $0x5d0] ss:$8 sps:$4 sm:$0xff]  }
 0x1be   :  { %3549 = vmatpush1.bf16.msra.mxu0 %v5097_v35  ;;  %3272 = vmatprep.subr.bf16.mxu1 %v5102_v36  ;;  %v5181_v35 = vld [vmem:[#allocation5 + $0xcd0] ss:$8 sps:$4 sm:$0xff]   ;;  %v5186_v36 = vld [vmem:[#allocation5 + $0x5e4] ss:$8 sps:$4 sm:$0xff]  }
 0x1bf   :  { %3559 = vmatprep.subr.bf16.mxu0 %v5105_v39  ;;  %v5187_v39 = vld [vmem:[#allocation5 + $0xce0] ss:$8 sps:$4 sm:$0xff]  }
 0x1c0   :  { %3264 = vmatmul.mubr.bf16.vlgmr.msra.gmra.mrb[0].mxu1 %v153_v41  ;;  %v5195_v41 = vld [vmem:[#allocation5 + $0xcf4] ss:$8 sps:$4 sm:$0xff]  }
 0x1c1   :  { %3551 = vmatmul.mubr.bf16.vlgmr.msra.gmra.mrb[0].mxu0 %v167_v42  ;;  %3273 = vmatpush1.bf16.msra.mxu1 %v5100_v44  ;;  %v5190_v42 = vld [vmem:[#allocation5 + $0x5f0] ss:$8 sps:$4 sm:$0xff]   ;;  %v125_v44 = vld [vmem:[#allocation2 + $0x50] sm:$0xff] }
 0x1c2   :  { %3560 = vmatpush1.bf16.msra.mxu0 %v5103_v45  ;;  %3274 = vmatprep.subr.bf16.mxu1 %v5108_v46  ;;  %v139_v45 = vld [vmem:[#allocation2 + $0xc0] sm:$0xff]  ;;  %v5198_v46 = vld [vmem:[#allocation5 + $0x604] ss:$8 sps:$4 sm:$0xff]  }
 0x1c3   :  { %3561 = vmatprep.subr.bf16.mxu0 %v5111_v47  ;;  %3304 = vmatprep.mubr.bf16.mxu1 %v156_v50  ;;  %v5201_v47 = vld [vmem:[#allocation5 + $0xd04] ss:$8 sps:$4 sm:$0xff]   ;;  %v128_v50 = vld [vmem:[#allocation2 + $0x68] sm:$0xff] }
 0x1c4   :  { %3591 = vmatprep.mubr.bf16.mxu0 %v170_v51  ;;  %v142_v51 = vld [vmem:[#allocation2 + $0xd8] sm:$0xff] }
 0x1c5   :  { %3275 = vmatpush1.bf16.msra.mxu1 %v5106_v48  ;;  %v155_v48 = vpack.c.bf16 %v125_v44, %v125_v44  ;;  %v5282_v44 = vld [vmem:[#allocation5 + $0x6e4] ss:$8 sps:$4 sm:$0xff]  }
 0x1c6   :  { %3562 = vmatpush1.bf16.msra.mxu0 %v5109_v49  ;;  %3276 = vmatprep.subr.bf16.mxu1 %v5114_v52  ;;  %v169_v49 = vpack.c.bf16 %v139_v45, %v139_v45  ;;  %v5196_v52 = vld [vmem:[#allocation5 + $0x600] ss:$8 sps:$4 sm:$0xff]   ;;  %v5285_v45 = vld [vmem:[#allocation5 + $0xde4] ss:$8 sps:$4 sm:$0xff]  }
 0x1c7   :  { %3563 = vmatprep.subr.bf16.mxu0 %v5117_v53  ;;  %v5199_v53 = vld [vmem:[#allocation5 + $0xd00] ss:$8 sps:$4 sm:$0xff]  }
 0x1c9   :  { %3277 = vmatpush1.bf16.msra.mxu1 %v5112_v54  ;;  %v5204_v54 = vld [vmem:[#allocation5 + $0x614] ss:$8 sps:$4 sm:$0xff]  }
 0x1ca   :  { %3564 = vmatpush1.bf16.msra.mxu0 %v5115_v55  ;;  %3278 = vmatprep.subr.bf16.mxu1 %v5120_v56  ;;  %v5207_v55 = vld [vmem:[#allocation5 + $0xd14] ss:$8 sps:$4 sm:$0xff]   ;;  %v158_v56 = vpack.c.bf16 %v128_v50, %v128_v50  ;;  %v5286_v50 = vld [vmem:[#allocation5 + $0x6f0] ss:$8 sps:$4 sm:$0xff]  }
 0x1cb   :  { %3565 = vmatprep.subr.bf16.mxu0 %v5123_v57  ;;  %v172_v57 = vpack.c.bf16 %v142_v51, %v142_v51  ;;  %v5289_v51 = vld [vmem:[#allocation5 + $0xdf0] ss:$8 sps:$4 sm:$0xff]  }
 0x1cd   :  { %3279 = vmatpush1.bf16.msra.mxu1 %v5118_v58  ;;  %v5202_v58 = vld [vmem:[#allocation5 + $0x610] ss:$8 sps:$4 sm:$0xff]  }
 0x1ce   :  { %3566 = vmatpush1.bf16.msra.mxu0 %v5121_v59  ;;  %3280 = vmatprep.subr.bf16.mxu1 %v5126_v60  ;;  %v5205_v59 = vld [vmem:[#allocation5 + $0xd10] ss:$8 sps:$4 sm:$0xff]   ;;  %v5210_v60 = vld [vmem:[#allocation5 + $0x624] ss:$8 sps:$4 sm:$0xff]  }
 0x1cf   :  { %3567 = vmatprep.subr.bf16.mxu0 %v5129_v61  ;;  %v5213_v61 = vld [vmem:[#allocation5 + $0xd24] ss:$8 sps:$4 sm:$0xff]  }
 0x1d1   :  { %3281 = vmatpush1.bf16.msra.mxu1 %v5124_v62  ;;  %v5208_v62 = vld [vmem:[#allocation5 + $0x620] ss:$8 sps:$4 sm:$0xff]  }
 0x1d2   :  { %3568 = vmatpush1.bf16.msra.mxu0 %v5127_v63  ;;  %3282 = vmatprep.subr.bf16.mxu1 %v5132_v0  ;;  %v5211_v63 = vld [vmem:[#allocation5 + $0xd20] ss:$8 sps:$4 sm:$0xff]   ;;  %v5216_v0 = vld [vmem:[#allocation5 + $0x634] ss:$8 sps:$4 sm:$0xff]  }
 0x1d3   :  { %3569 = vmatprep.subr.bf16.mxu0 %v5135_v1  ;;  %v5219_v1 = vld [vmem:[#allocation5 + $0xd34] ss:$8 sps:$4 sm:$0xff]  }
 0x1d5   :  { %3283 = vmatpush1.bf16.msra.mxu1 %v5130_v2  ;;  %v5214_v2 = vld [vmem:[#allocation5 + $0x630] ss:$8 sps:$4 sm:$0xff]  }
 0x1d6   :  { %3570 = vmatpush1.bf16.msra.mxu0 %v5133_v3  ;;  %3284 = vmatprep.subr.bf16.mxu1 %v5138_v4  ;;  %v5217_v3 = vld [vmem:[#allocation5 + $0xd30] ss:$8 sps:$4 sm:$0xff]   ;;  %v5222_v4 = vld [vmem:[#allocation5 + $0x644] ss:$8 sps:$4 sm:$0xff]  }
 0x1d7   :  { %3571 = vmatprep.subr.bf16.mxu0 %v5141_v5  ;;  %v5225_v5 = vld [vmem:[#allocation5 + $0xd44] ss:$8 sps:$4 sm:$0xff]  }
 0x1d9   :  { %3285 = vmatpush1.bf16.msra.mxu1 %v5136_v6  ;;  %v5220_v6 = vld [vmem:[#allocation5 + $0x640] ss:$8 sps:$4 sm:$0xff]  }
 0x1da   :  { %3572 = vmatpush1.bf16.msra.mxu0 %v5139_v7  ;;  %3286 = vmatprep.subr.bf16.mxu1 %v5144_v8  ;;  %v5223_v7 = vld [vmem:[#allocation5 + $0xd40] ss:$8 sps:$4 sm:$0xff]   ;;  %v5228_v8 = vld [vmem:[#allocation5 + $0x654] ss:$8 sps:$4 sm:$0xff]  }
 0x1db   :  { %3573 = vmatprep.subr.bf16.mxu0 %v5147_v9  ;;  %v5231_v9 = vld [vmem:[#allocation5 + $0xd54] ss:$8 sps:$4 sm:$0xff]  }
 0x1dd   :  { %3287 = vmatpush1.bf16.msra.mxu1 %v5142_v10  ;;  %v5226_v10 = vld [vmem:[#allocation5 + $0x650] ss:$8 sps:$4 sm:$0xff]  }
 0x1de   :  { %3574 = vmatpush1.bf16.msra.mxu0 %v5145_v11  ;;  %3288 = vmatprep.subr.bf16.mxu1 %v5150_v12  ;;  %v5229_v11 = vld [vmem:[#allocation5 + $0xd50] ss:$8 sps:$4 sm:$0xff]   ;;  %v5234_v12 = vld [vmem:[#allocation5 + $0x664] ss:$8 sps:$4 sm:$0xff]  }
 0x1df   :  { %3575 = vmatprep.subr.bf16.mxu0 %v5153_v13  ;;  %v5237_v13 = vld [vmem:[#allocation5 + $0xd64] ss:$8 sps:$4 sm:$0xff]  }
 0x1e1   :  { %3289 = vmatpush1.bf16.msra.mxu1 %v5148_v14  ;;  %v5232_v14 = vld [vmem:[#allocation5 + $0x660] ss:$8 sps:$4 sm:$0xff]  }
 0x1e2   :  { %3576 = vmatpush1.bf16.msra.mxu0 %v5151_v15  ;;  %3290 = vmatprep.subr.bf16.mxu1 %v5156_v16  ;;  %v5235_v15 = vld [vmem:[#allocation5 + $0xd60] ss:$8 sps:$4 sm:$0xff]   ;;  %v5240_v16 = vld [vmem:[#allocation5 + $0x674] ss:$8 sps:$4 sm:$0xff]  }
 0x1e3   :  { %3577 = vmatprep.subr.bf16.mxu0 %v5159_v17  ;;  %v5243_v17 = vld [vmem:[#allocation5 + $0xd74] ss:$8 sps:$4 sm:$0xff]  }
 0x1e5   :  { %3291 = vmatpush1.bf16.msra.mxu1 %v5154_v18  ;;  %v5238_v18 = vld [vmem:[#allocation5 + $0x670] ss:$8 sps:$4 sm:$0xff]  }
 0x1e6   :  { %3578 = vmatpush1.bf16.msra.mxu0 %v5157_v19  ;;  %3292 = vmatprep.subr.bf16.mxu1 %v5162_v20  ;;  %v5241_v19 = vld [vmem:[#allocation5 + $0xd70] ss:$8 sps:$4 sm:$0xff]   ;;  %v5246_v20 = vld [vmem:[#allocation5 + $0x684] ss:$8 sps:$4 sm:$0xff]  }
 0x1e7   :  { %3579 = vmatprep.subr.bf16.mxu0 %v5165_v21  ;;  %v5249_v21 = vld [vmem:[#allocation5 + $0xd84] ss:$8 sps:$4 sm:$0xff]  }
 0x1e9   :  { %3293 = vmatpush1.bf16.msra.mxu1 %v5160_v22  ;;  %v5244_v22 = vld [vmem:[#allocation5 + $0x680] ss:$8 sps:$4 sm:$0xff]  }
 0x1ea   :  { %3580 = vmatpush1.bf16.msra.mxu0 %v5163_v23  ;;  %3294 = vmatprep.subr.bf16.mxu1 %v5168_v24  ;;  %v5247_v23 = vld [vmem:[#allocation5 + $0xd80] ss:$8 sps:$4 sm:$0xff]   ;;  %v5252_v24 = vld [vmem:[#allocation5 + $0x694] ss:$8 sps:$4 sm:$0xff]  }
 0x1eb   :  { %3581 = vmatprep.subr.bf16.mxu0 %v5171_v25  ;;  %v5255_v25 = vld [vmem:[#allocation5 + $0xd94] ss:$8 sps:$4 sm:$0xff]  }
 0x1ed   :  { %3295 = vmatpush1.bf16.msra.mxu1 %v5166_v26  ;;  %v5250_v26 = vld [vmem:[#allocation5 + $0x690] ss:$8 sps:$4 sm:$0xff]  }
 0x1ee   :  { %3582 = vmatpush1.bf16.msra.mxu0 %v5169_v27  ;;  %3296 = vmatprep.subr.bf16.mxu1 %v5174_v28  ;;  %v5253_v27 = vld [vmem:[#allocation5 + $0xd90] ss:$8 sps:$4 sm:$0xff]   ;;  %v5258_v28 = vld [vmem:[#allocation5 + $0x6a4] ss:$8 sps:$4 sm:$0xff]  }
 0x1ef   :  { %3583 = vmatprep.subr.bf16.mxu0 %v5177_v29  ;;  %v5261_v29 = vld [vmem:[#allocation5 + $0xda4] ss:$8 sps:$4 sm:$0xff]  }
 0x1f1   :  { %3297 = vmatpush1.bf16.msra.mxu1 %v5172_v30  ;;  %v5256_v30 = vld [vmem:[#allocation5 + $0x6a0] ss:$8 sps:$4 sm:$0xff]  }
 0x1f2   :  { %3584 = vmatpush1.bf16.msra.mxu0 %v5175_v31  ;;  %3298 = vmatprep.subr.bf16.mxu1 %v5180_v32  ;;  %v5259_v31 = vld [vmem:[#allocation5 + $0xda0] ss:$8 sps:$4 sm:$0xff]   ;;  %v5264_v32 = vld [vmem:[#allocation5 + $0x6b4] ss:$8 sps:$4 sm:$0xff]  }
 0x1f3   :  { %3585 = vmatprep.subr.bf16.mxu0 %v5183_v33  ;;  %v5267_v33 = vld [vmem:[#allocation5 + $0xdb4] ss:$8 sps:$4 sm:$0xff]  }
 0x1f5   :  { %3299 = vmatpush1.bf16.msra.mxu1 %v5178_v34  ;;  %v5262_v34 = vld [vmem:[#allocation5 + $0x6b0] ss:$8 sps:$4 sm:$0xff]  }
 0x1f6   :  { %3586 = vmatpush1.bf16.msra.mxu0 %v5181_v35  ;;  %3300 = vmatprep.subr.bf16.mxu1 %v5186_v36  ;;  %v5265_v35 = vld [vmem:[#allocation5 + $0xdb0] ss:$8 sps:$4 sm:$0xff]   ;;  %v5270_v36 = vld [vmem:[#allocation5 + $0x6c4] ss:$8 sps:$4 sm:$0xff]  }
 0x1f7   :  { %3587 = vmatprep.subr.bf16.mxu0 %v5189_v37  ;;  %v5273_v37 = vld [vmem:[#allocation5 + $0xdc4] ss:$8 sps:$4 sm:$0xff]  }
 0x1f9   :  { %3301 = vmatpush1.bf16.msra.mxu1 %v5184_v38  ;;  %v5268_v38 = vld [vmem:[#allocation5 + $0x6c0] ss:$8 sps:$4 sm:$0xff]  }
 0x1fa   :  { %3588 = vmatpush1.bf16.msra.mxu0 %v5187_v39  ;;  %3302 = vmatprep.subr.bf16.mxu1 %v5192_v40  ;;  %v5271_v39 = vld [vmem:[#allocation5 + $0xdc0] ss:$8 sps:$4 sm:$0xff]   ;;  %v5276_v40 = vld [vmem:[#allocation5 + $0x6d4] ss:$8 sps:$4 sm:$0xff]  }
 0x1fb   :  { %3589 = vmatprep.subr.bf16.mxu0 %v5195_v41  ;;  %v5279_v41 = vld [vmem:[#allocation5 + $0xdd4] ss:$8 sps:$4 sm:$0xff]  }
 0x1fd   :  { %3303 = vmatpush1.bf16.msra.mxu1 %v5190_v42  ;;  %v5274_v42 = vld [vmem:[#allocation5 + $0x6d0] ss:$8 sps:$4 sm:$0xff]  }
 0x1fe   :  { %3590 = vmatpush1.bf16.msra.mxu0 %v5193_v43  ;;  %3313 = vmatprep.subr.bf16.mxu1 %v5198_v46  ;;  %v5277_v43 = vld [vmem:[#allocation5 + $0xdd0] ss:$8 sps:$4 sm:$0xff]   ;;  %v5280_v46 = vld [vmem:[#allocation5 + $0x6e0] ss:$8 sps:$4 sm:$0xff]  }
 0x1ff   :  { %3600 = vmatprep.subr.bf16.mxu0 %v5201_v47  ;;  %v5283_v47 = vld [vmem:[#allocation5 + $0xde0] ss:$8 sps:$4 sm:$0xff]  }
 0x200   :  { %3305 = vmatmul.mubr.bf16.vlgmr.msra.gmra.mrb[0].mxu1 %v155_v48  ;;  %v5288_v48 = vld [vmem:[#allocation5 + $0x6f4] ss:$8 sps:$4 sm:$0xff]  }
 0x201   :  { %3592 = vmatmul.mubr.bf16.vlgmr.msra.gmra.mrb[0].mxu0 %v169_v49  ;;  %3314 = vmatpush1.bf16.msra.mxu1 %v5196_v52  ;;  %v5291_v49 = vld [vmem:[#allocation5 + $0xdf4] ss:$8 sps:$4 sm:$0xff]  }
 0x202   :  { %3601 = vmatpush1.bf16.msra.mxu0 %v5199_v53  ;;  %3315 = vmatprep.subr.bf16.mxu1 %v5204_v54  ;;  %v127_v52 = vld [vmem:[#allocation2 + $0x60] sm:$0xff]  ;;  %v141_v53 = vld [vmem:[#allocation2 + $0xd0] sm:$0xff] }
 0x203   :  { %3602 = vmatprep.subr.bf16.mxu0 %v5207_v55  ;;  %3345 = vmatprep.mubr.bf16.mxu1 %v158_v56  ;;  %v5294_v54 = vld [vmem:[#allocation5 + $0xe04] ss:$8 sps:$4 sm:$0xff]   ;;  %v144_v55 = vld [vmem:[#allocation2 + $0xe8] sm:$0xff]  ;;  %v157_v56 = vpack.c.bf16 %v127_v52, %v127_v52  ;;  %v655_v52 = vld [vmem:[#allocation7] sm:$0x3] }
 0x204   :  { %3632 = vmatprep.mubr.bf16.mxu0 %v172_v57  ;;  %v171_v57 = vpack.c.bf16 %v141_v53, %v141_v53 }
 0x205   :  { %3316 = vmatpush1.bf16.msra.mxu1 %v5202_v58  ;;  %v5292_v58 = vld [vmem:[#allocation5 + $0xe00] ss:$8 sps:$4 sm:$0xff]  }
 0x206   :  { %3603 = vmatpush1.bf16.msra.mxu0 %v5205_v59  ;;  %3317 = vmatprep.subr.bf16.mxu1 %v5210_v60  ;;  %v174_v59 = vpack.c.bf16 %v144_v55, %v144_v55  ;;  %v5297_v60 = vld [vmem:[#allocation5 + $0xe14] ss:$8 sps:$4 sm:$0xff]  }
 0x207   :  { %3604 = vmatprep.subr.bf16.mxu0 %v5213_v61  ;;  %v5295_v61 = vld [vmem:[#allocation5 + $0xe10] ss:$8 sps:$4 sm:$0xff]  }
 0x209   :  { %3318 = vmatpush1.bf16.msra.mxu1 %v5208_v62  ;;  %v5300_v62 = vld [vmem:[#allocation5 + $0xe24] ss:$8 sps:$4 sm:$0xff]  }
 0x20a   :  { %3605 = vmatpush1.bf16.msra.mxu0 %v5211_v63  ;;  %3319 = vmatprep.subr.bf16.mxu1 %v5216_v0  ;;  %v5298_v63 = vld [vmem:[#allocation5 + $0xe20] ss:$8 sps:$4 sm:$0xff]   ;;  %v5303_v0 = vld [vmem:[#allocation5 + $0xe34] ss:$8 sps:$4 sm:$0xff]  }
 0x20b   :  { %3606 = vmatprep.subr.bf16.mxu0 %v5219_v1  ;;  %v5301_v1 = vld [vmem:[#allocation5 + $0xe30] ss:$8 sps:$4 sm:$0xff]  }
 0x20d   :  { %3320 = vmatpush1.bf16.msra.mxu1 %v5214_v2  ;;  %v5306_v2 = vld [vmem:[#allocation5 + $0xe44] ss:$8 sps:$4 sm:$0xff]  }
 0x20e   :  { %3607 = vmatpush1.bf16.msra.mxu0 %v5217_v3  ;;  %3321 = vmatprep.subr.bf16.mxu1 %v5222_v4  ;;  %v5304_v3 = vld [vmem:[#allocation5 + $0xe40] ss:$8 sps:$4 sm:$0xff]   ;;  %v5309_v4 = vld [vmem:[#allocation5 + $0xe54] ss:$8 sps:$4 sm:$0xff]  }
 0x20f   :  { %3608 = vmatprep.subr.bf16.mxu0 %v5225_v5  ;;  %v5307_v5 = vld [vmem:[#allocation5 + $0xe50] ss:$8 sps:$4 sm:$0xff]  }
 0x211   :  { %3322 = vmatpush1.bf16.msra.mxu1 %v5220_v6  ;;  %v5312_v6 = vld [vmem:[#allocation5 + $0xe64] ss:$8 sps:$4 sm:$0xff]  }
 0x212   :  { %3609 = vmatpush1.bf16.msra.mxu0 %v5223_v7  ;;  %3323 = vmatprep.subr.bf16.mxu1 %v5228_v8  ;;  %v5310_v7 = vld [vmem:[#allocation5 + $0xe60] ss:$8 sps:$4 sm:$0xff]   ;;  %v5315_v8 = vld [vmem:[#allocation5 + $0xe74] ss:$8 sps:$4 sm:$0xff]  }
 0x213   :  { %3610 = vmatprep.subr.bf16.mxu0 %v5231_v9  ;;  %v5313_v9 = vld [vmem:[#allocation5 + $0xe70] ss:$8 sps:$4 sm:$0xff]  }
 0x215   :  { %3324 = vmatpush1.bf16.msra.mxu1 %v5226_v10  ;;  %v5318_v10 = vld [vmem:[#allocation5 + $0xe84] ss:$8 sps:$4 sm:$0xff]  }
 0x216   :  { %3611 = vmatpush1.bf16.msra.mxu0 %v5229_v11  ;;  %3325 = vmatprep.subr.bf16.mxu1 %v5234_v12  ;;  %v5316_v11 = vld [vmem:[#allocation5 + $0xe80] ss:$8 sps:$4 sm:$0xff]   ;;  %v5321_v12 = vld [vmem:[#allocation5 + $0xe94] ss:$8 sps:$4 sm:$0xff]  }
 0x217   :  { %3612 = vmatprep.subr.bf16.mxu0 %v5237_v13  ;;  %v5319_v13 = vld [vmem:[#allocation5 + $0xe90] ss:$8 sps:$4 sm:$0xff]  }
 0x219   :  { %3326 = vmatpush1.bf16.msra.mxu1 %v5232_v14  ;;  %v5324_v14 = vld [vmem:[#allocation5 + $0xea4] ss:$8 sps:$4 sm:$0xff]  }
 0x21a   :  { %3613 = vmatpush1.bf16.msra.mxu0 %v5235_v15  ;;  %3327 = vmatprep.subr.bf16.mxu1 %v5240_v16  ;;  %v5322_v15 = vld [vmem:[#allocation5 + $0xea0] ss:$8 sps:$4 sm:$0xff]   ;;  %v5327_v16 = vld [vmem:[#allocation5 + $0xeb4] ss:$8 sps:$4 sm:$0xff]  }
 0x21b   :  { %3614 = vmatprep.subr.bf16.mxu0 %v5243_v17  ;;  %v5325_v17 = vld [vmem:[#allocation5 + $0xeb0] ss:$8 sps:$4 sm:$0xff]  }
 0x21d   :  { %3328 = vmatpush1.bf16.msra.mxu1 %v5238_v18  ;;  %v5330_v18 = vld [vmem:[#allocation5 + $0xec4] ss:$8 sps:$4 sm:$0xff]  }
 0x21e   :  { %3615 = vmatpush1.bf16.msra.mxu0 %v5241_v19  ;;  %3329 = vmatprep.subr.bf16.mxu1 %v5246_v20  ;;  %v5328_v19 = vld [vmem:[#allocation5 + $0xec0] ss:$8 sps:$4 sm:$0xff]   ;;  %v5333_v20 = vld [vmem:[#allocation5 + $0xed4] ss:$8 sps:$4 sm:$0xff]  }
 0x21f   :  { %3616 = vmatprep.subr.bf16.mxu0 %v5249_v21  ;;  %v5331_v21 = vld [vmem:[#allocation5 + $0xed0] ss:$8 sps:$4 sm:$0xff]  }
 0x221   :  { %3330 = vmatpush1.bf16.msra.mxu1 %v5244_v22  ;;  %v5336_v22 = vld [vmem:[#allocation5 + $0xee4] ss:$8 sps:$4 sm:$0xff]  }
 0x222   :  { %3617 = vmatpush1.bf16.msra.mxu0 %v5247_v23  ;;  %3331 = vmatprep.subr.bf16.mxu1 %v5252_v24  ;;  %v5334_v23 = vld [vmem:[#allocation5 + $0xee0] ss:$8 sps:$4 sm:$0xff]   ;;  %v5339_v24 = vld [vmem:[#allocation5 + $0xef4] ss:$8 sps:$4 sm:$0xff]  }
 0x223   :  { %3618 = vmatprep.subr.bf16.mxu0 %v5255_v25  ;;  %v5337_v25 = vld [vmem:[#allocation5 + $0xef0] ss:$8 sps:$4 sm:$0xff]  }
 0x225   :  { %3332 = vmatpush1.bf16.msra.mxu1 %v5250_v26  ;;  %v143_v26 = vld [vmem:[#allocation2 + $0xe0] sm:$0xff] }
 0x226   :  { %3619 = vmatpush1.bf16.msra.mxu0 %v5253_v27  ;;  %3333 = vmatprep.subr.bf16.mxu1 %v5258_v28  ;;  %v173_v27 = vpack.c.bf16 %v143_v26, %v143_v26  ;;  %v5340_v28 = vld [vmem:[#allocation8 + $0x40] sm:$0xff]  }
 0x227   :  { %3620 = vmatprep.subr.bf16.mxu0 %v5261_v29  ;;  %v5341_v29 = vld [vmem:[#allocation8] sm:$0xff]  }
 0x229   :  { %3334 = vmatpush1.bf16.msra.mxu1 %v5256_v30  ;;  %v5342_v30 = vld [vmem:[#allocation8 + $0x48] sm:$0xff]  }
 0x22a   :  { %3621 = vmatpush1.bf16.msra.mxu0 %v5259_v31  ;;  %3335 = vmatprep.subr.bf16.mxu1 %v5264_v32  ;;  %v5343_v31 = vld [vmem:[#allocation8 + $0x8] sm:$0xff]   ;;  %v5344_v32 = vld [vmem:[#allocation8 + $0x50] sm:$0xff]  }
 0x22b   :  { %3622 = vmatprep.subr.bf16.mxu0 %v5267_v33  ;;  %v5345_v33 = vld [vmem:[#allocation8 + $0x10] sm:$0xff]  }
 0x22d   :  { %3336 = vmatpush1.bf16.msra.mxu1 %v5262_v34  ;;  %v5346_v34 = vld [vmem:[#allocation8 + $0x58] sm:$0xff]  }
 0x22e   :  { %3623 = vmatpush1.bf16.msra.mxu0 %v5265_v35  ;;  %3337 = vmatprep.subr.bf16.mxu1 %v5270_v36  ;;  %v5347_v35 = vld [vmem:[#allocation8 + $0x18] sm:$0xff]   ;;  %v5348_v36 = vld [vmem:[#allocation8 + $0x60] sm:$0xff]  }
 0x22f   :  { %3624 = vmatprep.subr.bf16.mxu0 %v5273_v37  ;;  %v5349_v37 = vld [vmem:[#allocation8 + $0x20] sm:$0xff]  }
 0x231   :  { %3338 = vmatpush1.bf16.msra.mxu1 %v5268_v38  ;;  %v5350_v38 = vld [vmem:[#allocation8 + $0x68] sm:$0xff]  }
 0x232   :  { %3625 = vmatpush1.bf16.msra.mxu0 %v5271_v39  ;;  %3339 = vmatprep.subr.bf16.mxu1 %v5276_v40  ;;  %v5351_v39 = vld [vmem:[#allocation8 + $0x28] sm:$0xff]   ;;  %v5352_v40 = vld [vmem:[#allocation8 + $0x70] sm:$0xff]  }
 0x233   :  { %3626 = vmatprep.subr.bf16.mxu0 %v5279_v41  ;;  %v5353_v41 = vld [vmem:[#allocation8 + $0x30] sm:$0xff]  }
 0x235   :  { %3340 = vmatpush1.bf16.msra.mxu1 %v5274_v42  ;;  %v5354_v42 = vld [vmem:[#allocation8 + $0x78] sm:$0xff]  }
 0x236   :  { %3627 = vmatpush1.bf16.msra.mxu0 %v5277_v43  ;;  %3341 = vmatprep.subr.bf16.mxu1 %v5282_v44  ;;  %v5355_v43 = vld [vmem:[#allocation8 + $0x38] sm:$0xff]   ;;  %v5561_v44 = vmov 0.0  }
 0x237   :  { %3628 = vmatprep.subr.bf16.mxu0 %v5285_v45 }
 0x239   :  { %3342 = vmatpush1.bf16.msra.mxu1 %v5280_v46 }
 0x23a   :  { %3629 = vmatpush1.bf16.msra.mxu0 %v5283_v47  ;;  %3343 = vmatprep.subr.bf16.mxu1 %v5288_v48 }
 0x23b   :  { %3630 = vmatprep.subr.bf16.mxu0 %v5291_v49  ;;  %v657_v49 = vlaneseq }
 0x23d   :  { %3344 = vmatpush1.bf16.msra.mxu1 %v5286_v50  ;;  %v658_v50 = vshrl.u32 %v657_v49, 7 }
 0x23e   :  { %3631 = vmatpush1.bf16.msra.mxu0 %v5289_v51  ;;  %4499 = vmatprep.subr.bf16.mxu1 %v5340_v28 }
 0x23f   :  { %3641 = vmatprep.subr.bf16.mxu0 %v5294_v54  ;;  %v659_v51 = vsub.s32 0, %v658_v50  ;;  %v663_v53 = vsub.s32 1, %v658_v50 }
 0x240   :  { %3346 = vmatmul.mubr.bf16.vlgmr.msra.gmra.mrb[0].mxu1 %v157_v56 }
 0x241   :  { %3633 = vmatmul.mubr.bf16.vlgmr.msra.gmra.mrb[0].mxu0 %v171_v57  ;;  %4500 = vmatpush3.bf16.msra.mxu1 %v5341_v29  ;;  %v660_v54 = vrot.slane %v655_v52, %v659_v51  ;;  %v664_v55 = vrot.slane %v655_v52, %v663_v53 }
 0x242   :  { %3642 = vmatpush1.bf16.msra.mxu0 %v5292_v58  ;;  %3673 = vmatprep.mubr.bf16.mxu0 %v174_v59 }
 0x243   :  { %3643 = vmatprep.subr.bf16.mxu0 %v5297_v60  ;;  %4501 = vmatprep.subr.bf16.mxu1 %v5342_v30 }
 0x245   :  { %4502 = vmatpush3.bf16.msra.mxu1 %v5343_v31 }
 0x246   :  { %3644 = vmatpush1.bf16.msra.mxu0 %v5295_v61  ;;  %4503 = vmatprep.subr.bf16.mxu1 %v5344_v32 }
 0x247   :  { %3645 = vmatprep.subr.bf16.mxu0 %v5300_v62 }
 0x249   :  { %4504 = vmatpush3.bf16.msra.mxu1 %v5345_v33 }
 0x24a   :  { %3646 = vmatpush1.bf16.msra.mxu0 %v5298_v63  ;;  %4505 = vmatprep.subr.bf16.mxu1 %v5346_v34 }
 0x24b   :  { %3647 = vmatprep.subr.bf16.mxu0 %v5303_v0 }
 0x24d   :  { %4506 = vmatpush3.bf16.msra.mxu1 %v5347_v35 }
 0x24e   :  { %3648 = vmatpush1.bf16.msra.mxu0 %v5301_v1  ;;  %4507 = vmatprep.subr.bf16.mxu1 %v5348_v36 }
 0x24f   :  { %3649 = vmatprep.subr.bf16.mxu0 %v5306_v2 }
 0x251   :  { %4508 = vmatpush3.bf16.msra.mxu1 %v5349_v37 }
 0x252   :  { %3650 = vmatpush1.bf16.msra.mxu0 %v5304_v3  ;;  %4509 = vmatprep.subr.bf16.mxu1 %v5350_v38  ;;  %v5356_v3 = vld [vmem:[#allocation11] sm:$0xff]  }
 0x253   :  { %3651 = vmatprep.subr.bf16.mxu0 %v5309_v4 }
 0x255   :  { %4510 = vmatpush3.bf16.msra.mxu1 %v5351_v39 }
 0x256   :  { %3652 = vmatpush1.bf16.msra.mxu0 %v5307_v5  ;;  %4511 = vmatprep.subr.bf16.mxu1 %v5352_v40  ;;  %v5357_v5 = vld [vmem:[#allocation11 + $0x8] sm:$0xff]  }
 0x257   :  { %3653 = vmatprep.subr.bf16.mxu0 %v5312_v6  ;;  %v5358_v6 = vld [vmem:[#allocation11 + $0x10] sm:$0xff]  }
 0x259   :  { %4512 = vmatpush3.bf16.msra.mxu1 %v5353_v41 }
 0x25a   :  { %3654 = vmatpush1.bf16.msra.mxu0 %v5310_v7  ;;  %4513 = vmatprep.subr.bf16.mxu1 %v5354_v42  ;;  %v5359_v7 = vld [vmem:[#allocation11 + $0x18] sm:$0xff]  }
 0x25b   :  { %3655 = vmatprep.subr.bf16.mxu0 %v5315_v8  ;;  %v5360_v8 = vld [vmem:[#allocation11 + $0x20] sm:$0xff]  }
 0x25d   :  { %4514 = vmatpush3.bf16.msra.mxu1 %v5355_v43 }
 0x25e   :  { %3656 = vmatpush1.bf16.msra.mxu0 %v5313_v9  ;;  %4530 = vmatprep.subr.bf16.mxu1 %v5561_v44  ;;  %v5361_v9 = vld [vmem:[#allocation11 + $0x28] sm:$0xff]  }
 0x25f   :  { %3657 = vmatprep.subr.bf16.mxu0 %v5318_v10  ;;  %v5362_v10 = vld [vmem:[#allocation11 + $0x30] sm:$0xff]  }
 0x262   :  { %3658 = vmatpush1.bf16.msra.mxu0 %v5316_v11  ;;  %v5363_v11 = vld [vmem:[#allocation11 + $0x38] sm:$0xff]  }
 0x263   :  { %3659 = vmatprep.subr.bf16.mxu0 %v5321_v12 }
 0x266   :  { %3660 = vmatpush1.bf16.msra.mxu0 %v5319_v13  ;;  %v4473_v13 = vld [vmem:[#allocation10] ss:$0 sm:$0xff] }
 0x267   :  { %3661 = vmatprep.subr.bf16.mxu0 %v5324_v14 }
 0x26a   :  { %3662 = vmatpush1.bf16.msra.mxu0 %v5322_v15 }
 0x26b   :  { %3663 = vmatprep.subr.bf16.mxu0 %v5327_v16 }
 0x26e   :  { %3664 = vmatpush1.bf16.msra.mxu0 %v5325_v17 }
 0x26f   :  { %3665 = vmatprep.subr.bf16.mxu0 %v5330_v18 }
 0x272   :  { %3666 = vmatpush1.bf16.msra.mxu0 %v5328_v19 }
 0x273   :  { %3667 = vmatprep.subr.bf16.mxu0 %v5333_v20 }
 0x276   :  { %3668 = vmatpush1.bf16.msra.mxu0 %v5331_v21  ;;  %v4490_v21 = vld [vmem:[#allocation13] ss:$0 sm:$0xff] }
 0x277   :  { %3669 = vmatprep.subr.bf16.mxu0 %v5336_v22 }
 0x27a   :  { %3670 = vmatpush1.bf16.msra.mxu0 %v5334_v23 }
 0x27b   :  { %3671 = vmatprep.subr.bf16.mxu0 %v5339_v24 }
 0x27e   :  { %3672 = vmatpush1.bf16.msra.mxu0 %v5337_v25 }
 0x281   :  { %3674 = vmatmul.mubr.bf16.vlgmr.msra.gmra.mrb[0].mxu0 %v173_v27 }
 0x313   :  { %v3347_v45 = vpop.f32.mrb[0].mxu1 }
 0x314   :  { %v3349_v46 = vpop.f32.mrb[1].mxu1  ;;  %v4550_v56 = vadd.f32 %v3347_v45, %v660_v54 }
 0x315   :  { %v3351_v47 = vpop.f32.mrb[2].mxu1  ;;  %v4552_v57 = vadd.f32 %v3349_v46, %v664_v55 }
 0x316   :  { %v3352_v48 = vpop.f32.mrb[3].mxu1 }
 0x354   :  { %v3675_v58 = vpop.f32.mrb[0].mxu0 }
 0x355   :  { %v4551_v59 = vadd.f32 %v4550_v56, %v3675_v58  ;;  %v3677_v60 = vpop.f32.mrb[1].mxu0 }
 0x356   :  { %v4553_v61 = vadd.f32 %v4552_v57, %v3677_v60  ;;  %v3679_v62 = vpop.f32.mrb[2].mxu0 }
 0x357   :  { %v3682_v63 = vmax.f32 %v4551_v59, 0.0  ;;  %v3680_v0 = vpop.f32.mrb[3].mxu0 }
 0x358   :  { %v3683_v1 = vmax.f32 %v4553_v61, 0.0 }
 0x359   :  { %v3684_v4 = vpack.c.bf16 %v3682_v63, %v3682_v63 }
 0x35a   :  { %v3685_v2 = vpack.c.bf16 %v3683_v1, %v3683_v1 }
 0x35c   :  { %3853 = vmatprep.mubr.bf16.mxu1 %v3685_v2 }
 0x35d   :  { %3854 = vmatmul.mubr.bf16.vlgmr.msra.gmra.mrb[4].mxu1 %v3684_v4 }
 0x35e   :  { %4531 = vmatpush3.bf16.msra.mxu1 %v5356_v3  ;;  %4546 = vmatprep.mubr.msk.bf16.mxu1 %vm5562_vm0, %v5561_v44 }
 0x35f   :  { %4532 = vmatprep.subr.bf16.mxu1 %v5561_v44 }
 0x362   :  { %4533 = vmatpush3.bf16.msra.mxu1 %v5357_v5 }
 0x363   :  { %4534 = vmatprep.subr.bf16.mxu1 %v5561_v44 }
 0x366   :  { %4535 = vmatpush3.bf16.msra.mxu1 %v5358_v6 }
 0x367   :  { %4536 = vmatprep.subr.bf16.mxu1 %v5561_v44 }
 0x36a   :  { %4537 = vmatpush3.bf16.msra.mxu1 %v5359_v7 }
 0x36b   :  { %4538 = vmatprep.subr.bf16.mxu1 %v5561_v44 }
 0x36e   :  { %4539 = vmatpush3.bf16.msra.mxu1 %v5360_v8 }
 0x36f   :  { %4540 = vmatprep.subr.bf16.mxu1 %v5561_v44 }
 0x372   :  { %4541 = vmatpush3.bf16.msra.mxu1 %v5361_v9 }
 0x373   :  { %4542 = vmatprep.subr.bf16.mxu1 %v5561_v44 }
 0x376   :  { %4543 = vmatpush3.bf16.msra.mxu1 %v5362_v10 }
 0x377   :  { %4544 = vmatprep.subr.bf16.mxu1 %v5561_v44 }
 0x37a   :  { %4545 = vmatpush3.bf16.msra.mxu1 %v5363_v11 }
 0x430   :  { %v4515_v12 = vpop.f32.mrb[4].mxu1 }
 0x431   :  { %v4516_v14 = vpop.f32.mrb[5].mxu1 }
 0x432   :  { %v4517_v15 = vadd.f32 %v4516_v14, %v4515_v12  ;;  %v4518_v16 = vpop.f32.mrb[6].mxu1 }
 0x433   :  { %v4519_v17 = vpop.f32.mrb[7].mxu1 }
 0x434   :  { %v3856_v18 = vadd.f32 %v4517_v15, %v4473_v13 }
 0x436   :  { %v3861_v19 = vmax.f32 %v3856_v18, 0.0 }
 0x438   :  { %v3862_v20 = vpack.c.bf16 %v3861_v19, %v3861_v19 }
 0x43a   :  { %4547 = vmatmul.mubr.bf16.vlgmr.msra.gmra.mrb[8].mxu1 %v3862_v20 }
 0x50d   :  { %v3968_v22 = vpop.f32.mrb[8].mxu1 }
 0x50e   :  { %v3969_v23 = vadd.f32 %v4490_v21, %v3968_v22  ;;  %v4548_v24 = vpop.f32.mrb[9].mxu1 }
 0x50f   :  { %v3971_v25 = vpop.f32.mrb[10].mxu1 }
 0x510   :  { %3974 = vst [vmem:[#allocation14] sm:$0xff] %v3969_v23  ;;  %v4549_v26 = vpop.f32.mrb[11].mxu1 }
 0x511   :  { %5529 = shalt.err (!%p5526_p4)
}
 0x512   :  { %s5530_s15 = scalar_lea.hbm %s5707_s7, 128 }
 0x513   :  { %p5531_p5 = scmp.ne.s32.totalorder %s5707_s7, %s5530_s15  ;;  %p5534_p6 = scmp.lt.u32.totalorder %s5530_s15, %s5707_s7 }
 0x515   :  { %p5536_p7 = pnand %p5534_p6, %p5531_p5 }
 0x517   :  { %5539 = shalt.err (!%p5536_p7)
}
 0x518   :  { %3984 = dma.vmem_to_hbm [thread:$0]  %s3982_s13, 128, %s5707_s7, [#allocation4]  }
 0x519   :  { %5548 = dma.done.wait [#allocation4], 128  }
 0x51a   :  { %5549 = vsyncadd [#allocation4], 4294967168 }
 0x51b   :  { %3988 = vsyncpa [#allocation3], 1 }
 0x51c   :  { %3989 = vsyncpa [#allocation6], 1 }
 0x51d   :  { %3990 = vsyncpa [#allocation9], 1 }
 0x51e   :  { %3991 = vsyncpa [#allocation12], 1 }
 0x51f   :  { %3992 = vsyncpa [#allocation4], 1 }

</bundles_post_ra>
